<compile_context>
chip_gen: v5e
topology: v5e:2x2
jax: 0.10.0
libtpu: 0.0.40
codegen_flags: <defaults>
</compile_context>

<pallas_src>
import functools

import jax
import jax.numpy as jnp
from jax.experimental import pallas as pl
from jax.experimental.pallas import tpu as pltpu


_LANE_GROUP = 128            # original rows packed into one lane-dense row
_SUBLANE_ALIGN = 16          # covers both f32 (8) and bf16 (16) sublane tiling
_TARGET_TILE_BYTES = 8 * 1024 * 1024    # ~8 MiB x tiles (review: 6-8 MiB)
_VMEM_LIMIT_BYTES = 48 * 1024 * 1024    # worst case ~25 MiB used; < v7x 64 MiB
# f32 path: HIGHEST keeps the x*m products and the segment sum f32-exact on
# the MXU.  (HIGH / bf16_3x would be marginally better on v5e's roofline but
# is not uniformly supported by the Mosaic dot lowering, so we pin the safe,
# exact choice and document the v5e trade-off here.)
_F32_MXU_PRECISION = jax.lax.Precision.HIGHEST


def _linear_model_kernel(bias_ref, x_ref, segm_ref, o_ref, *, precision):
    # x_ref:    (TP, W) packed lane-dense rows, W = 128 * num_species
    # segm_ref: (W, 128) with segm[k, j] = m[k % S] * (k // S == j): the MXU
    #           performs the scale and the per-row segment sum in one pass.
    # bias_ref: (1,) f32 SMEM scalar holding num_species * b (0 when b=None)
    # o_ref:    (TP, 128) lane-dense output slab (unmasked 128-wide stores)
    acc = jnp.dot(x_ref[...], segm_ref[...],
                  preferred_element_type=jnp.float32,
                  precision=precision)
    o_ref[...] = (acc + bias_ref[0]).astype(o_ref.dtype)


def _fallback(x2, m1, bias_total, out_dtype):
    y = (x2.astype(jnp.float32) * m1).sum(-1) + bias_total
    return y.astype(out_dtype)


def linear_model_forward(x, m, b=None, *,
                         min_rows_for_pallas=4096,
                         max_species_for_pallas=32):
    """JAX/Pallas equivalent of _LinearModel.forward.

    x: (..., num_species); m: (num_species,); b: None, scalar or (1,).
    Returns x.shape[:-1] in float32 (bfloat16 if x is bfloat16).
    """
    orig_shape = x.shape
    S = int(orig_shape[-1])
    B = 1
    for d in orig_shape[:-1]:
        B *= int(d)

    in_is_bf16 = x.dtype == jnp.bfloat16
    compute_dtype = jnp.bfloat16 if in_is_bf16 else jnp.float32
    out_dtype = compute_dtype

    x2 = x.reshape(B, S)
    if x2.dtype != compute_dtype:
        x2 = x2.astype(compute_dtype)        # bf16 stays bf16: half the HBM traffic
    m1 = jnp.asarray(m).reshape(S).astype(jnp.float32)
    b0 = (jnp.asarray(b).reshape(()).astype(jnp.float32) if b is not None
          else jnp.zeros((), jnp.float32))
    bias_total = b0 * float(S)               # b is added per element before the sum

    # Tiny batches / wide species: XLA's fused multiply+reduce is already near
    # roofline and the (128*S, 128) segm matrix + launch overhead would not pay.
    if B < min_rows_for_pallas or S > max_species_for_pallas:
        return _fallback(x2, m1, bias_total, out_dtype).reshape(orig_shape[:-1])

    R = _LANE_GROUP
    W = R * S
    itemsize = jnp.dtype(compute_dtype).itemsize

    # Tile sizing: ~8 MiB x tiles, but keep >= 4 grid steps when there is
    # enough work (v7x megacore sharding + pipeline overlap), and always a
    # multiple of 16 packed rows (valid for both f32 and bf16 blocks).
    P_total = B // R
    TP = _TARGET_TILE_BYTES // (W * itemsize)
    if P_total >= 4 * _SUBLANE_ALIGN:
        TP = min(TP, pl.cdiv(P_total, 4))
    TP = min(TP, P_total)
    TP = max(_SUBLANE_ALIGN, (TP // _SUBLANE_ALIGN) * _SUBLANE_ALIGN)

    # Pallas runs on the largest prefix that is a whole number of tiles, so the
    # packed (P, W) view is a pure reshape (no pad copy) and every block is
    # full (no partial tiles).  The < one-tile tail is finished by the fused
    # XLA fallback, which is also memory-bound and near roofline.
    chunk_rows = TP * R
    B_main = (B // chunk_rows) * chunk_rows
    if B_main == 0:
        return _fallback(x2, m1, bias_total, out_dtype).reshape(orig_shape[:-1])

    x_main = x2 if B_main == B else x2[:B_main]
    P = B_main // R
    x_packed = x_main.reshape(P, W)
    grid = (P // TP,)

    # segm[k, j] = m[k % S] * (k // S == j): scale folded into the MXU
    # segment-sum matrix.  Constant block index -> fetched into VMEM once.
    lane = jnp.arange(W, dtype=jnp.int32)
    segm = jnp.where(
        (lane[:, None] // S) == jnp.arange(R, dtype=jnp.int32)[None, :],
        jnp.tile(m1, R)[:, None], 0.0).astype(compute_dtype)

    precision = None if in_is_bf16 else _F32_MXU_PRECISION
    out_itemsize = jnp.dtype(out_dtype).itemsize
    cost = pl.CostEstimate(
        flops=2 * P * W * R + P * R,
        transcendentals=0,
        bytes_accessed=P * W * itemsize + P * R * out_itemsize + W * R * itemsize,
    )

    out = pl.pallas_call(
        functools.partial(_linear_model_kernel, precision=precision),
        out_shape=jax.ShapeDtypeStruct((P, R), out_dtype),
        grid_spec=pl.GridSpec(
            grid=grid,
            in_specs=[
                pl.BlockSpec(memory_space=pltpu.SMEM),           # S*b scalar
                pl.BlockSpec((TP, W), lambda i: (i, 0)),         # x tile (pipelined)
                pl.BlockSpec((W, R), lambda i: (0, 0)),          # segm (fetched once)
            ],
            out_specs=pl.BlockSpec((TP, R), lambda i: (i, 0)),   # lane-dense out
        ),
        compiler_params=pltpu.CompilerParams(
            dimension_semantics=("parallel",),    # v7x: shard steps over 2 TCs
            vmem_limit_bytes=_VMEM_LIMIT_BYTES,
        ),
        cost_estimate=cost,
    )(bias_total.reshape(1), x_packed, segm)

    y = out.reshape(B_main)
    if B_main != B:
        y_tail = _fallback(x2[B_main:], m1, bias_total, out_dtype)
        y = jnp.concatenate([y, y_tail], axis=0)
    return y.reshape(orig_shape[:-1])


if __name__ == "__main__":
    key = jax.random.PRNGKey(0)
    k1, k2, k3, k4, k5, k6 = jax.random.split(key, 6)

    S = 4

    def ref(x, m, b):
        y = x.astype(jnp.float32) * jnp.asarray(m).astype(jnp.float32)
        if b is not None:
            y = y + jnp.asarray(b, jnp.float32).reshape(())
        return y.sum(-1)

    m_rand = jax.random.normal(k1, (S,), jnp.float32)
    b_rand = jax.random.normal(k2, (1,), jnp.float32)
    m_ones = jnp.ones((S,), jnp.float32)      # module default init
    b_zero = jnp.zeros((1,), jnp.float32)     # fit_intercept=True default init

    # Case 1: multi-dim leading shape, tile-aligned -> f32 Pallas path, 4 grid
    # steps (exercises the pipelined, megacore-shardable grid).
    x1 = jax.random.normal(k3, (2, 4096, S), jnp.float32)
    y1 = jax.block_until_ready(linear_model_forward(x1, m_rand, b_rand))
    assert y1.shape == (2, 4096)
    assert jnp.allclose(y1, ref(x1, m_rand, b_rand), atol=1e-4, rtol=1e-4)
    y1n = jax.block_until_ready(linear_model_forward(x1, m_rand, None))
    assert jnp.allclose(y1n, ref(x1, m_rand, None), atol=1e-4, rtol=1e-4)

    # Case 2: unaligned batch -> Pallas prefix + fused-XLA tail (no pad copy).
    x2 = jax.random.normal(k4, (5333, S), jnp.float32)
    y2 = jax.block_until_ready(linear_model_forward(x2, m_rand, b_rand))
    assert y2.shape == (5333,)
    assert jnp.allclose(y2, ref(x2, m_rand, b_rand), atol=1e-4, rtol=1e-4)

    # Case 3: bf16 input -> bf16 DMA tiles (half the HBM traffic), bf16 output.
    x3 = jax.random.normal(k5, (6144, S), jnp.float32).astype(jnp.bfloat16)
    y3 = jax.block_until_ready(linear_model_forward(x3, m_rand, b_rand))
    assert y3.dtype == jnp.bfloat16
    ref3 = ref(x3, m_rand.astype(jnp.bfloat16), b_rand)  # m is bf16 in-kernel
    assert jnp.allclose(y3.astype(jnp.float32), ref3, atol=5e-2, rtol=2e-2)

    # Case 4: tiny batch (module default init) -> jnp fallback.
    x4 = jax.random.normal(k6, (8, S), jnp.float32)
    y4 = jax.block_until_ready(linear_model_forward(x4, m_ones, b_zero))
    assert jnp.allclose(y4, ref(x4, m_ones, b_zero), atol=1e-5, rtol=1e-5)

    # Case 5: wide species dim (> 32) -> jnp fallback (segm would not pay off).
    x5 = jax.random.normal(k3, (4096, 48), jnp.float32)
    m5 = jax.random.normal(k4, (48,), jnp.float32)
    y5 = jax.block_until_ready(linear_model_forward(x5, m5, None))
    assert jnp.allclose(y5, ref(x5, m5, None), atol=1e-4, rtol=1e-4)

    # TODO(synk): the PyTorch forward also mutates its input in place (x *= m);
    # only the returned value is reproduced in functional JAX.
    print("KERNEL_OK")
</pallas_src>

<mosaic_0001>
module attributes {stable_mosaic.version = 11 : i64} {
  func.func @_linear_model_kernel(%arg0: i32, %arg1: memref<1xf32, #tpu.memory_space<smem>>, %arg2: memref<16x512xf32, #tpu.memory_space<vmem>>, %arg3: memref<512x128xf32, #tpu.memory_space<vmem>>, %arg4: memref<16x128xf32, #tpu.memory_space<vmem>>) attributes {dimension_semantics = [#tpu.dimension_semantics<parallel>], iteration_bounds = array<i64: 4>, scalar_prefetch = 0 : i64, scratch_operands = 0 : i64, tpu.core_type = #tpu.core_type<tc>, window_params = [{transform_indices = @transform_0, window_bounds = array<i64: 1>}, {transform_indices = @transform_1, window_bounds = array<i64: 16, 512>}, {pipeline_mode = #tpu.pipeline_mode<synchronous>, transform_indices = @transform_2, window_bounds = array<i64: 512, 128>}, {transform_indices = @transform_3, window_bounds = array<i64: 16, 128>}]} {
    %c0 = arith.constant 0 : index
    %c0_0 = arith.constant 0 : index
    %0 = vector.load %arg2[%c0, %c0_0] : memref<16x512xf32, #tpu.memory_space<vmem>>, vector<16x512xf32>
    %c0_1 = arith.constant 0 : index
    %c0_2 = arith.constant 0 : index
    %1 = vector.load %arg3[%c0_1, %c0_2] : memref<512x128xf32, #tpu.memory_space<vmem>>, vector<512x128xf32>
    %cst = arith.constant dense<0.000000e+00> : vector<16x128xf32>
    %2 = tpu.matmul %0, %1, %cst {dimension_numbers = #tpu.dot_dimension_numbers<[1], [0], [0], [1], [0, 0, 1, 1], [], []>, precision = #tpu.contract_precision<fp32>} : vector<16x512xf32>, vector<512x128xf32>, vector<16x128xf32> -> vector<16x128xf32>
    %c0_3 = arith.constant 0 : index
    %3 = memref.load %arg1[%c0_3] : memref<1xf32, #tpu.memory_space<smem>>
    %4 = vector.broadcast %3 : f32 to vector<16x128xf32>
    %5 = arith.addf %2, %4 : vector<16x128xf32>
    %c0_4 = arith.constant 0 : index
    %c0_5 = arith.constant 0 : index
    %6 = vector.load %arg4[%c0_4, %c0_5] : memref<16x128xf32, #tpu.memory_space<vmem>>, vector<16x128xf32>
    tpu.vector_store %arg4[%c0_4, %c0_5], %5 {strides = array<i32>} : memref<16x128xf32, #tpu.memory_space<vmem>>, vector<16x128xf32>,
    return
  }
  func.func @transform_0(%arg0: i32) -> i32 {
    %c0_i32 = arith.constant 0 : i32
    %c0_i32_0 = arith.constant 0 : i32
    return %c0_i32 : i32
  }
  func.func @transform_1(%arg0: i32) -> (i32, i32) {
    %c0_i32 = arith.constant 0 : i32
    %c0_i32_0 = arith.constant 0 : i32
    return %arg0, %c0_i32 : i32, i32
  }
  func.func @transform_2(%arg0: i32) -> (i32, i32) {
    %c0_i32 = arith.constant 0 : i32
    %c0_i32_0 = arith.constant 0 : i32
    %c0_i32_1 = arith.constant 0 : i32
    return %c0_i32, %c0_i32_0 : i32, i32
  }
  func.func @transform_3(%arg0: i32) -> (i32, i32) {
    %c0_i32 = arith.constant 0 : i32
    %c0_i32_0 = arith.constant 0 : i32
    return %arg0, %c0_i32 : i32, i32
  }
}

</mosaic_0001>

<bundles_post_ra>
// kernel: tpu_custom_call.1
= control target key start
LH: loop header
LB: loop body
LE: loop exit
PB: predicated region body
PF: predicated region fallthrough
CT: control target
= control target key end

     0   :  { %s3336_s0 = inlined_call_operand.<no memory space> [shape: f32[1], index: 0, kind: input, shape index: {}]   ;;  %s3337_s1 = inlined_call_operand.hbm [shape: f32[64,512], index: 1, kind: input, shape index: {}]   ;;  %s3338_s2 = inlined_call_operand.hbm [shape: f32[512,128], index: 2, kind: input, shape index: {}]   ;;  %s3339_s3 = inlined_call_operand.hbm [shape: f32[64,128], index: 3, kind: output, shape index: {}]  }
   0x1   :  { %8 = sst [smem:[#allocation2]] %s3336_s0 }
   0x2   :  { %9 = vsyncpa [#allocation4], 0 }
   0x3   :  { %11 = vsyncpa [#allocation4 + $0x1], 0 }
   0x4   :  { %12 = vsyncpa [#allocation7], 0 }
   0x5   :  { %13 = vsyncpa [#allocation5], 0 }
   0x6   :  { %15 = vsyncpa [#allocation5 + $0x1], 0  ;;  %s2120_s14 = smov 0   ;;  %s2122_s15 = smov 0  }
   0x7   :  { %s2124_s16 = smov 0   ;;  %s2126_s17 = smov 0  }
   0x8 LB: > { %s2141_s0 = sadd.s32 4294967295, %s2088_s17   ;;  %s1875_s18 = sadd.s32 4294967294, %s2088_s17   ;;  %s2088_s17 = sphi %s2126_s17, %s3457_s17   ;;  %s2084_s16 = sphi %s2124_s16, %s3456_s16   ;;  %s2080_s15 = sphi %s2122_s15, %s3455_s15   ;;  %s2076_s14 = sphi %s2120_s14, %s3454_s14  }
   0x9   : > { %p62_p0 = scmp.ne.s32.totalorder %s2080_s15, %s2076_s14  ;;  %p63_p1 = scmp.eq.s32.totalorder %s2141_s0, 0 }
   0xa   : > { %p107_p2 = scmp.eq.s32.totalorder %s2141_s0, 3  ;;  %p113_p3 = scmp.eq.s32.totalorder %s1875_s18, 3 }
   0xb   : > { %p2150_p4 = por %p63_p1, %p62_p0  ;;  %p1876_p5 = scmp.ge.s32.totalorder %s2088_s17, 1 }
   0xc   : > { %p2155_p6 = por %p113_p3, %p62_p0  ;;  %p120_p7 = scmp.lt.s32.totalorder %s2088_s17, 5 }
   0xd   : > { %s134_s23 = sshll.u32 %s3338_s2, 4  ;;  %s2090_s25 = smov [#allocation6]   ;;  %s135_s23 = int_to_ptr.hbm [resolvable:$true] %s134_s23 }
   0xe   : > { %p2163_p8 = pnand %p1876_p5, %p120_p7  ;;  %s136_s26 = sshll.u32 %s2090_s25, 4  ;;  %s137_s26 = int_to_ptr.vmem [resolvable:$true] %s136_s26 }
   0xf   : > { %s2172_s27 = sadd.s32 1, %s2088_s17   ;;  %s2091_s28 = smov 128  }
  0x10   : > { %p1903_p9 = pneg %p2163_p8  ;;  %s2092_s29 = smov 8  }
  0x11   : > { %s46_s30 = ssub.s32 %s2088_s17, %s2172_s27  ;;  %s49_s4 = sadd.s32 1, %s2084_s16 }
  0x12   : > { %p1904_p10 = pnand %p1903_p9, %p63_p1  ;;  %p47_p11 = scmp.eq.s32.totalorder %s46_s30, 0 }
  0x13   : > { %p56_p12 = scmp.ne.s32.totalorder %s2084_s16, %s2080_s15  ;;  %p57_p13 = scmp.eq.s32.totalorder %s2088_s17, 0 }
  0x14   : > { %1906 = dma.hbm_to_vmem [thread:$0]  (!%p1904_p10), %s135_s23, 8192, %s137_s26, [#allocation7], %s2091_s28, %s2091_s28, %s2092_s29  }
  0x15   : > { %p1916_p0 = scmp.lt.s32.totalorder %s2088_s17, 4  ;;  %p58_p3 = por %p57_p13, %p56_p12 }
  0x16   : > { %s2182_s5 = scalar_select %p47_p11, %s2084_s16, %s49_s4  }
  0x17   : > { %p2186_p5 = por %p107_p2, %p56_p12  ;;  %s150_s7 = sand.u32 1, %s2084_s16  }
  0x18   : > { %s1893_s8 = sshll.u32 %s2088_s17, 6  ;;  %s1879_s9 = sshll.u32 %s150_s7, 6 }
  0x19   : > { %s160_s12 = scalar_lea.hbm %s3337_s1, %s1893_s8  ;;  %s154_s18 = scalar_lea.vmem [#allocation3], %s1879_s9 }
  0x1a   : > { %s161_s13 = sshll.u32 %s160_s12, 4  ;;  %s163_s21 = sshll.u32 %s154_s18, 4  ;;  %s162_s13 = int_to_ptr.hbm [resolvable:$true] %s161_s13  ;;  %s164_s21 = int_to_ptr.vmem [resolvable:$true] %s163_s21 }
  0x1b   : > { %p2197_p7 = pnand %p1916_p0, %p58_p3  ;;  %s151_s23 = scalar_lea.sflag [#allocation4], %s150_s7 }
  0x1c   : > { %s1988_s25 = sshra.s32 %s162_s13, 4  ;;  %s1995_s30 = scalar_lea.hbm %s3337_s1, 256  ;;  %s1989_s25 = int_to_ptr.hbm [resolvable:$true] %s1988_s25 }
  0x1d   : > { %s1990_s26 = scalar_lea.hbm %s1989_s25, 64  ;;  %p1992_p9 = pneg %p2197_p7 }
  0x1e   : > { %p1991_p2 = scmp.ne.s32.totalorder %s1989_s25, %s1990_s26  ;;  %p1996_p12 = scmp.lt.s32.totalorder %s1989_s25, %s3337_s1 }
  0x1f   : > { %p1997_p13 = scmp.lt.s32.totalorder %s1995_s30, %s1990_s26 }
  0x20   : > { %p1993_p10 = pnand %p1992_p9, %p1991_p2 }
  0x21   : > { %p1998_p0 = por %p1997_p13, %p1996_p12 }
  0x22   : > { %p1994_p11 = pneg %p1993_p10 }
  0x24   : > { %p1999_p3 = pnand %p1998_p0, %p1994_p11 }
  0x26   : > { %2002 = shalt.err (!%p1999_p3)
}
  0x27   : > { %s2093_s7 = smov 512   ;;  %s2094_s9 = smov 32  }
  0x28   : > { %1910 = dma.hbm_to_vmem [thread:$0]  (!%p2197_p7), %s162_s13, 1024, %s164_s21, %s151_s23, %s2093_s7, %s2093_s7, %s2094_s9  }
  0x29   : > { %175 = sbr.rel (%p2163_p8) target bundleno = 417 (0x1a1), region = 32 }
  0x2e   : > { %s2214_s10 = sand.u32 1, %s2080_s15  }
  0x2f   : > { %s1884_s11 = sshll.u32 %s2214_s10, 6  ;;  %s178_s12 = scalar_lea.sflag [#allocation4], %s2214_s10 }
  0x30   : > { %s2218_s18 = scalar_lea.vmem [#allocation3], %s1884_s11 }
  0x31   : > { %2063 = dma.done.wait (%p2150_p4), %s178_s12, 1024  }
  0x32   : > { %2065 = vsyncadd (%p2150_p4), %s178_s12, 4294966272 }
  0x33   : > { %2067 = dma.done.wait (%p63_p1), [#allocation7], 8192  }
  0x34   : > { %2069 = vsyncadd (%p63_p1), [#allocation7], 4294959104  ;;  %v235_v0 = vld [vmem:[#allocation6 + $0x78] sm:$0xff]  ;;  %v234_v1 = vld [vmem:[#allocation6 + $0x70] sm:$0xff]  ;;  %s284_s19 = sld [smem:[#allocation2]]  ;;  %s1886_s24 = sshll.u32 %s2214_s10, 4 }
  0x35   : > { %v233_v2 = vld [vmem:[#allocation6 + $0x68] sm:$0xff]  ;;  %v2228_v3 = vand.u32 4294901760, %v235_v0  ;;  %v2230_v4 = vand.u32 4294901760, %v234_v1  ;;  %v232_v6 = vld [vmem:[#allocation6 + $0x60] sm:$0xff]  ;;  %v231_v7 = vld [vmem:[#allocation6 + $0x58] sm:$0xff]  ;;  %s1894_s13 = sshll.u32 %s2141_s0, 4 }
  0x36   : > { %v2232_v5 = vand.u32 4294901760, %v233_v2  ;;  %v230_v8 = vld [vmem:[#allocation6 + $0x50] sm:$0xff]  ;;  %v2234_v9 = vand.u32 4294901760, %v232_v6  ;;  %v2236_v10 = vand.u32 4294901760, %v231_v7  ;;  %v229_v12 = vld [vmem:[#allocation6 + $0x48] sm:$0xff]  ;;  %v228_v13 = vld [vmem:[#allocation6 + $0x40] sm:$0xff]  ;;  %s1788_s23 = scalar_lea.hbm %s3339_s3, %s1894_s13 }
  0x37   : > { %v2238_v11 = vand.u32 4294901760, %v230_v8  ;;  %287 = vmatpush.msra.mxu0 %v2228_v3  ;;  %v2242_v14 = vsub.f32 %v235_v0, %v2228_v3  ;;  %v2245_v15 = vsub.f32 %v234_v1, %v2230_v4  ;;  %500 = vmatpush.msra.mxu3 %v2228_v3  ;;  %v2251_v17 = vand.u32 4294901760, %v229_v12  ;;  %v227_v18 = vld [vmem:[#allocation6 + $0x38] sm:$0xff]  ;;  %v226_v26 = vld [vmem:[#allocation6 + $0x30] sm:$0xff]  ;;  %v225_v36 = vld [vmem:[#allocation6 + $0x28] sm:$0xff]  ;;  %s209_s25 = scalar_lea.vmem [#allocation8], %s1886_s24 }
  0x38   : > { %v2249_v16 = vsub.f32 %v233_v2, %v2232_v5  ;;  %v2254_v19 = vsub.f32 %v232_v6, %v2234_v9  ;;  %v2257_v20 = vsub.f32 %v231_v7, %v2236_v10  ;;  %v2259_v21 = vand.u32 4294901760, %v228_v13  ;;  %v224_v42 = vld [vmem:[#allocation6 + $0x20] sm:$0xff]  ;;  %v223_v48 = vld [vmem:[#allocation6 + $0x18] sm:$0xff]  ;;  %v222_v54 = vld [vmem:[#allocation6 + $0x10] sm:$0xff]  ;;  %s1789_s26 = sshll.u32 %s209_s25, 4  ;;  %s1791_s28 = sshll.u32 %s1788_s23, 4  ;;  %s1790_s26 = int_to_ptr.vmem [resolvable:$true] %s1789_s26  ;;  %s1792_s28 = int_to_ptr.hbm [resolvable:$true] %s1791_s28 }
  0x39   : > { %289 = vmatpush.msra.mxu0 %v2230_v4  ;;  %442 = vmatpush.msra.mxu2 %v2242_v14  ;;  %v337_v22 = vand.u32 4294901760, %v2242_v14  ;;  %v3355_v23 = vand.u32 4294901760, %v2245_v15  ;;  %v2267_v25 = vsub.f32 %v230_v8, %v2238_v11  ;;  %v2271_v28 = vand.u32 4294901760, %v227_v18  ;;  %v251_v59 = vld [vmem:[#allocation6 + $0xf8] sm:$0xff]  ;;  %v221_v61 = vld [vmem:[#allocation6 + $0x8] sm:$0xff]  ;;  %v250_v2 = vld [vmem:[#allocation6 + $0xf0] sm:$0xff] }
  0x3a   : > { %v3353_v24 = vand.u32 4294901760, %v2249_v16  ;;  %502 = vmatpush.msra.mxu3 %v2230_v4  ;;  %v3352_v27 = vand.u32 4294901760, %v2254_v19  ;;  %v2274_v29 = vsub.f32 %v229_v12, %v2251_v17  ;;  %v3349_v33 = vand.u32 4294901760, %v2257_v20  ;;  %v220_v7 = vld [vmem:[#allocation6] sm:$0xff]  ;;  %s1777_s0 = scalar_lea.sflag [#allocation5], %s2214_s10  ;;  %s2032_s29 = sshra.s32 %s1792_s28, 4  ;;  %s2033_s29 = int_to_ptr.hbm [resolvable:$true] %s2032_s29 }
  0x3b   : > { %291 = vmatpush.msra.mxu0 %v2232_v5  ;;  %445 = vmatpush.msra.mxu2 %v2245_v15  ;;  %v338_v30 = vsub.f32 %v2242_v14, %v337_v22  ;;  %v344_v31 = vsub.f32 %v2245_v15, %v3355_v23  ;;  %v2289_v34 = vand.u32 4294901760, %v226_v26  ;;  %v2292_v35 = vsub.f32 %v228_v13, %v2259_v21  ;;  %v242_v23 = vld [vmem:[#allocation6 + $0xb0] sm:$0xff]  ;;  %s2034_s30 = scalar_lea.hbm %s2033_s29, 16  ;;  %s2038_s7 = scalar_lea.hbm %s3339_s3, 64 }
  0x3c   : > { %v350_v32 = vsub.f32 %v2249_v16, %v3353_v24  ;;  %504 = vmatpush.msra.mxu3 %v2232_v5  ;;  %v356_v39 = vsub.f32 %v2254_v19, %v3352_v27  ;;  %v3348_v40 = vand.u32 4294901760, %v2267_v25  ;;  %v2302_v41 = vsub.f32 %v227_v18, %v2271_v28  ;;  %p2035_p1 = scmp.ne.s32.totalorder %s2033_s29, %s2034_s30  ;;  %p2039_p7 = scmp.lt.s32.totalorder %s2033_s29, %s3339_s3 }
  0x3d   : > { %293 = vmatpush.msra.mxu0 %v2234_v9  ;;  %v339_v37 = vand.u32 4294901760, %v338_v30  ;;  %448 = vmatpush.msra.mxu2 %v2249_v16  ;;  %v345_v38 = vand.u32 4294901760, %v344_v31  ;;  %v362_v44 = vsub.f32 %v2257_v20, %v3349_v33  ;;  %v2308_v45 = vand.u32 4294901760, %v225_v36  ;;  %p2040_p2 = scmp.lt.s32.totalorder %s2038_s7, %s2034_s30 }
  0x3e   : > { %506 = vmatpush.msra.mxu3 %v2234_v9  ;;  %v351_v43 = vand.u32 4294901760, %v350_v32  ;;  %v3346_v46 = vand.u32 4294901760, %v2274_v29  ;;  %v3345_v47 = vand.u32 4294901760, %v2292_v35  ;;  %v357_v49 = vand.u32 4294901760, %v356_v39  ;;  %v249_v32 = vld [vmem:[#allocation6 + $0xe8] sm:$0xff]  ;;  %p2036_p4 = pnand %p2035_p1, %p2186_p5 }
  0x3f   : > { %295 = vmatpush.msra.mxu0 %v2236_v10  ;;  %340 = vmatpush.msra.mxu1 %v339_v37  ;;  %v368_v50 = vsub.f32 %v2267_v25, %v3348_v40  ;;  %v2318_v51 = vand.u32 4294901760, %v224_v42  ;;  %v2321_v52 = vsub.f32 %v226_v26, %v2289_v34  ;;  %v3343_v53 = vand.u32 4294901760, %v2302_v41  ;;  %p2041_p9 = por %p2040_p2, %p2039_p7 }
  0x40   : > { %451 = vmatpush.msra.mxu2 %v2254_v19  ;;  %508 = vmatpush.msra.mxu3 %v2236_v10  ;;  %v363_v55 = vand.u32 4294901760, %v362_v44  ;;  %v374_v56 = vsub.f32 %v2274_v29, %v3346_v46  ;;  %v2330_v57 = vand.u32 4294901760, %v223_v48  ;;  %v2333_v58 = vsub.f32 %v225_v36, %v2308_v45  ;;  %p2037_p8 = pneg %p2036_p4 }
  0x41   : > { %297 = vmatpush.msra.mxu0 %v2238_v11  ;;  %346 = vmatpush.msra.mxu1 %v345_v38  ;;  %v380_v60 = vsub.f32 %v2292_v35, %v3345_v47  ;;  %v369_v62 = vand.u32 4294901760, %v368_v50  ;;  %v2341_v63 = vand.u32 4294901760, %v222_v54  ;;  %v3342_v0 = vand.u32 4294901760, %v2321_v52 }
  0x42   : > { %454 = vmatpush.msra.mxu2 %v2257_v20  ;;  %510 = vmatpush.msra.mxu3 %v2238_v11  ;;  %v2345_v1 = vsub.f32 %v224_v42, %v2318_v51  ;;  %v386_v6 = vsub.f32 %v2302_v41, %v3343_v53  ;;  %v2352_v8 = vand.u32 4294901760, %v251_v59  ;;  %v375_v12 = vand.u32 4294901760, %v374_v56  ;;  %v248_v42 = vld [vmem:[#allocation6 + $0xe0] sm:$0xff]  ;;  %p2042_p10 = pnand %p2041_p9, %p2037_p8 }
  0x43   : > { %299 = vmatpush.msra.mxu0 %v2251_v17  ;;  %352 = vmatpush.msra.mxu1 %v351_v43  ;;  %v2355_v13 = vand.u32 4294901760, %v221_v61  ;;  %v3340_v18 = vand.u32 4294901760, %v2333_v58  ;;  %v2359_v26 = vsub.f32 %v223_v48, %v2330_v57  ;;  %v381_v30 = vand.u32 4294901760, %v380_v60 }
  0x44   : > { %457 = vmatpush.msra.mxu2 %v2267_v25  ;;  %512 = vmatpush.msra.mxu3 %v2251_v17  ;;  %v2363_v31 = vand.u32 4294901760, %v250_v2  ;;  %v392_v36 = vsub.f32 %v2321_v52, %v3342_v0  ;;  %v2369_v37 = vand.u32 4294901760, %v220_v7  ;;  %v3341_v38 = vand.u32 4294901760, %v2345_v1 }
  0x45   : > { %301 = vmatpush.msra.mxu0 %v2259_v21  ;;  %358 = vmatpush.msra.mxu1 %v357_v49  ;;  %v2373_v39 = vsub.f32 %v222_v54, %v2341_v63  ;;  %v387_v43 = vand.u32 4294901760, %v386_v6  ;;  %v2378_v44 = vsub.f32 %v251_v59, %v2352_v8  ;;  %v398_v48 = vsub.f32 %v2333_v58, %v3340_v18  ;;  %v246_v18 = vld [vmem:[#allocation6 + $0xd0] sm:$0xff] }
  0x46   : > { %460 = vmatpush.msra.mxu2 %v2274_v29  ;;  %514 = vmatpush.msra.mxu3 %v2259_v21  ;;  %3389 = vst [vmem:[#allocation12_spill] sm:$0xff] %v2369_v37  ;;  %v3344_v49 = vand.u32 4294901760, %v2359_v26  ;;  %v2386_v50 = vsub.f32 %v221_v61, %v2355_v13  ;;  %v2388_v54 = vand.u32 4294901760, %v249_v32  ;;  %v2393_v56 = vsub.f32 %v250_v2, %v2363_v31 }
  0x47   : > { %303 = vmatpush.msra.mxu0 %v2271_v28  ;;  %364 = vmatpush.msra.mxu1 %v363_v55  ;;  %v247_v55 = vld [vmem:[#allocation6 + $0xd8] sm:$0xff]  ;;  %v2395_v59 = vand.u32 4294901760, %v248_v42  ;;  %v393_v60 = vand.u32 4294901760, %v392_v36  ;;  %v404_v61 = vsub.f32 %v2345_v1, %v3341_v38  ;;  %v2403_v6 = vsub.f32 %v220_v7, %v2369_v37 }
  0x48   : > { %463 = vmatpush.msra.mxu2 %v2292_v35  ;;  %516 = vmatpush.msra.mxu3 %v2271_v28  ;;  %v3350_v2 = vand.u32 4294901760, %v2378_v44  ;;  %v410_v36 = vsub.f32 %v2359_v26, %v3344_v49  ;;  %v3351_v7 = vand.u32 4294901760, %v2386_v50  ;;  %v2416_v38 = vsub.f32 %v249_v32, %v2388_v54 }
  0x49   : > { %305 = vmatpush.msra.mxu0 %v2289_v34  ;;  %370 = vmatpush.msra.mxu1 %v369_v62  ;;  %v3347_v62 = vand.u32 4294901760, %v2373_v39  ;;  %v3354_v0 = vand.u32 4294901760, %v2393_v56  ;;  %v2422_v53 = vsub.f32 %v248_v42, %v2395_v59  ;;  %v3356_v32 = vand.u32 4294901760, %v2403_v6 }
  0x4a   : > { %466 = vmatpush.msra.mxu2 %v2302_v41  ;;  %518 = vmatpush.msra.mxu3 %v2289_v34  ;;  %v2429_v47 = vand.u32 4294901760, %v246_v18  ;;  %v710_v42 = vsub.f32 %v2378_v44, %v3350_v2  ;;  %v3357_v40 = vand.u32 4294901760, %v2416_v38  ;;  %v3390_v14 = vand.u32 4294901760, %v2245_v15 }
  0x4b   : > { %307 = vmatpush.msra.mxu0 %v2308_v45  ;;  %376 = vmatpush.msra.mxu1 %v375_v12  ;;  %v2408_v12 = vand.u32 4294901760, %v247_v55  ;;  %v416_v49 = vsub.f32 %v2373_v39, %v3347_v62  ;;  %v422_v62 = vsub.f32 %v2386_v50, %v3351_v7  ;;  %v428_v7 = vsub.f32 %v2403_v6, %v3356_v32 }
  0x4c   : > { %469 = vmatpush.msra.mxu2 %v2321_v52  ;;  %520 = vmatpush.msra.mxu3 %v2308_v45  ;;  %v2457_v27 = vsub.f32 %v246_v18, %v2429_v47  ;;  %v722_v18 = vsub.f32 %v2416_v38, %v3357_v40  ;;  %v2485_v15 = vand.u32 4294901760, %v242_v23 }
  0x4d   : > { %309 = vmatpush.msra.mxu0 %v2318_v51  ;;  %382 = vmatpush.msra.mxu1 %v381_v30  ;;  %v399_v30 = vand.u32 4294901760, %v398_v48  ;;  %v405_v48 = vand.u32 4294901760, %v404_v61  ;;  %v2437_v46 = vsub.f32 %v247_v55, %v2408_v12  ;;  %v411_v61 = vand.u32 4294901760, %v410_v36 }
  0x4e   : > { %472 = vmatpush.msra.mxu2 %v2333_v58  ;;  %522 = vmatpush.msra.mxu3 %v2318_v51  ;;  %v716_v55 = vsub.f32 %v2393_v56, %v3354_v0  ;;  %v417_v36 = vand.u32 4294901760, %v416_v49  ;;  %v711_v0 = vand.u32 4294901760, %v710_v42  ;;  %v423_v49 = vand.u32 4294901760, %v422_v62 }
  0x4f   : > { %311 = vmatpush.msra.mxu0 %v2330_v57  ;;  %388 = vmatpush.msra.mxu1 %v387_v43  ;;  %v245_v43 = vld [vmem:[#allocation6 + $0xc8] sm:$0xff]  ;;  %v3391_v42 = vand.u32 4294901760, %v2422_v53  ;;  %v429_v40 = vand.u32 4294901760, %v428_v7  ;;  %v723_v7 = vand.u32 4294901760, %v722_v18 }
  0x50   : > { %475 = vmatpush.msra.mxu2 %v2345_v1  ;;  %524 = vmatpush.msra.mxu3 %v2330_v57  ;;  %v2444_v33 = vand.u32 4294901760, %v245_v43 }
  0x51   : > { %313 = vmatpush.msra.mxu0 %v2341_v63  ;;  %394 = vmatpush.msra.mxu1 %v393_v60  ;;  %v244_v60 = vld [vmem:[#allocation6 + $0xc0] sm:$0xff]  ;;  %v728_v62 = vsub.f32 %v2422_v53, %v3391_v42 }
  0x52   : > { %478 = vmatpush.msra.mxu2 %v2359_v26  ;;  %526 = vmatpush.msra.mxu3 %v2341_v63  ;;  %v2459_v24 = vand.u32 4294901760, %v244_v60 }
  0x53   : > { %315 = vmatpush.msra.mxu0 %v2355_v13  ;;  %400 = vmatpush.msra.mxu1 %v399_v30  ;;  %v243_v30 = vld [vmem:[#allocation6 + $0xb8] sm:$0xff] }
  0x54   : > { %481 = vmatpush.msra.mxu2 %v2373_v39  ;;  %528 = vmatpush.msra.mxu3 %v2355_v13  ;;  %v2472_v32 = vand.u32 4294901760, %v243_v30  ;;  %v2483_v2 = vsub.f32 %v244_v60, %v2459_v24 }
  0x55   : > { %317 = vmatpush.msra.mxu0 %v2369_v37  ;;  %406 = vmatpush.msra.mxu1 %v405_v48  ;;  %v2470_v48 = vsub.f32 %v245_v43, %v2444_v33 }
  0x56   : > { %484 = vmatpush.msra.mxu2 %v2386_v50  ;;  %530 = vmatpush.msra.mxu3 %v2369_v37  ;;  %v2495_v60 = vsub.f32 %v243_v30, %v2472_v32  ;;  %v2508_v30 = vsub.f32 %v242_v23, %v2485_v15 }
  0x57   : > { %547 = vmatpush.msrb.mxu0 %v337_v22  ;;  %412 = vmatpush.msra.mxu1 %v411_v61  ;;  %v717_v22 = vand.u32 4294901760, %v716_v55  ;;  %v241_v61 = vld [vmem:[#allocation6 + $0xa8] sm:$0xff]  ;;  %v3393_v55 = vand.u32 4294901760, %v2437_v46 }
  0x58   : > { %487 = vmatpush.msra.mxu2 %v2403_v6  ;;  %712 = vmatpush.msrb.mxu3 %v711_v0  ;;  %v2497_v37 = vand.u32 4294901760, %v241_v61  ;;  %v729_v0 = vand.u32 4294901760, %v728_v62 }
  0x59   : > { %551 = vmatpush.msrb.mxu0 %v3390_v14  ;;  %418 = vmatpush.msra.mxu1 %v417_v36  ;;  %v3392_v14 = vand.u32 4294901760, %v2249_v16  ;;  %v734_v42 = vsub.f32 %v2437_v46, %v3393_v55  ;;  %v240_v36 = vld [vmem:[#allocation6 + $0xa0] sm:$0xff]  ;;  %v3394_v16 = vand.u32 4294901760, %v2254_v19  ;;  %v3396_v19 = vand.u32 4294901760, %v2257_v20  ;;  %v239_v55 = vld [vmem:[#allocation6 + $0x98] sm:$0xff] }
  0x5a   : > { %659 = vmatpush.msrb.mxu2 %v2352_v8  ;;  %718 = vmatpush.msrb.mxu3 %v717_v22  ;;  %v2510_v43 = vand.u32 4294901760, %v240_v36  ;;  %v2521_v23 = vsub.f32 %v241_v61, %v2497_v37  ;;  %v3398_v20 = vand.u32 4294901760, %v2267_v25 }
  0x5b   : > { %555 = vmatpush.msrb.mxu0 %v3392_v14  ;;  %424 = vmatpush.msra.mxu1 %v423_v49  ;;  %v212_v14 = vld [vmem:[%s2218_s18] sm:$0xff]  ;;  %v3395_v49 = vand.u32 4294901760, %v2457_v27  ;;  %v735_v22 = vand.u32 4294901760, %v734_v42  ;;  %v3399_v42 = vand.u32 4294901760, %v2483_v2 }
  0x5c   : > { %661 = vmatpush.msrb.mxu2 %v2363_v31  ;;  %724 = vmatpush.msrb.mxu3 %v723_v7  ;;  %v2534_v61 = vsub.f32 %v240_v36, %v2510_v43 }
  0x5d   : > { %559 = vmatpush.msrb.mxu0 %v3394_v16  ;;  %430 = vmatpush.msra.mxu1 %v429_v40  ;;  %v740_v18 = vsub.f32 %v2457_v27, %v3395_v49  ;;  %v3397_v40 = vand.u32 4294901760, %v2470_v48  ;;  %v2523_v49 = vand.u32 4294901760, %v212_v14  ;;  %v752_v7 = vsub.f32 %v2483_v2, %v3399_v42 }
  0x5e   : > { %663 = vmatpush.msrb.mxu2 %v2388_v54  ;;  %730 = vmatpush.msrb.mxu3 %v729_v0  ;;  %v3400_v16 = vand.u32 4294901760, %v2274_v29  ;;  %v3401_v0 = vand.u32 4294901760, %v2495_v60  ;;  %v237_v29 = vld [vmem:[#allocation6 + $0x88] sm:$0xff]  ;;  %v775_v42 = vand.u32 4294901760, %v2534_v61 }
  0x5f   : > { %563 = vmatpush.msrb.mxu0 %v3396_v19  ;;  %618 = vmatpush.msrb.mxu1 %v2228_v3  ;;  %v746_v62 = vsub.f32 %v2470_v48, %v3397_v40  ;;  %v741_v3 = vand.u32 4294901760, %v740_v18  ;;  %v763_v19 = vand.u32 4294901760, %v2508_v30  ;;  %v238_v40 = vld [vmem:[#allocation6 + $0x90] sm:$0xff]  ;;  %v2547_v36 = vsub.f32 %v212_v14, %v2523_v49 }
  0x60   : > { %665 = vmatpush.msrb.mxu2 %v2395_v59  ;;  %736 = vmatpush.msrb.mxu3 %v735_v22  ;;  %v758_v18 = vsub.f32 %v2495_v60, %v3401_v0  ;;  %v753_v22 = vand.u32 4294901760, %v752_v7  ;;  %v3403_v14 = vand.u32 4294901760, %v2302_v41  ;;  %v236_v0 = vld [vmem:[#allocation6 + $0x80] sm:$0xff] }
  0x61   : > { %567 = vmatpush.msrb.mxu0 %v3398_v20  ;;  %620 = vmatpush.msrb.mxu1 %v2230_v4  ;;  %v2539_v4 = vand.u32 4294901760, %v239_v55  ;;  %v747_v25 = vand.u32 4294901760, %v746_v62  ;;  %v3359_v20 = vand.u32 4294901760, %v2521_v23  ;;  %v764_v62 = vsub.f32 %v2508_v30, %v763_v19 }
  0x62   : > { %667 = vmatpush.msrb.mxu2 %v2408_v12  ;;  %742 = vmatpush.msrb.mxu3 %v741_v3  ;;  %v759_v3 = vand.u32 4294901760, %v758_v18  ;;  %v320_v41 = vand.u32 4294901760, %v2547_v36  ;;  %v2583_v18 = vand.u32 4294901760, %v236_v0 }
  0x63   : > { %571 = vmatpush.msrb.mxu0 %v3400_v16  ;;  %622 = vmatpush.msrb.mxu1 %v2232_v5  ;;  %v3402_v16 = vand.u32 4294901760, %v2292_v35  ;;  %v2552_v5 = vand.u32 4294901760, %v238_v40  ;;  %v2563_v35 = vsub.f32 %v239_v55, %v2539_v4  ;;  %v770_v7 = vsub.f32 %v2521_v23, %v3359_v20 }
  0x64   : > { %669 = vmatpush.msrb.mxu2 %v2429_v47  ;;  %748 = vmatpush.msrb.mxu3 %v747_v25  ;;  %v765_v55 = vand.u32 4294901760, %v764_v62  ;;  %v776_v25 = vsub.f32 %v2534_v61, %v775_v42  ;;  %v321_v62 = vsub.f32 %v2547_v36, %v320_v41 }
  0x65   : > { %575 = vmatpush.msrb.mxu0 %v3402_v16  ;;  %624 = vmatpush.msrb.mxu1 %v2234_v9  ;;  %v2565_v9 = vand.u32 4294901760, %v237_v29  ;;  %v216_v16 = vld [vmem:[%s2218_s18 + $0x20] sm:$0xff] }
  0x66   : > { %671 = vmatpush.msrb.mxu2 %v2444_v33  ;;  %754 = vmatpush.msrb.mxu3 %v753_v22  ;;  %v2585_v20 = vand.u32 4294901760, %v216_v16  ;;  %v771_v22 = vand.u32 4294901760, %v770_v7  ;;  %v213_v7 = vld [vmem:[%s2218_s18 + $0x8] sm:$0xff] }
  0x67   : > { %579 = vmatpush.msrb.mxu0 %v3403_v14  ;;  %626 = vmatpush.msrb.mxu1 %v2236_v10  ;;  %v3404_v14 = vand.u32 4294901760, %v2321_v52  ;;  %v2577_v10 = vsub.f32 %v238_v40, %v2552_v5  ;;  %v3405_v52 = vand.u32 4294901760, %v2333_v58  ;;  %v2592_v40 = vsub.f32 %v237_v29, %v2565_v9 }
  0x68   : > { %673 = vmatpush.msrb.mxu2 %v2459_v24  ;;  %760 = vmatpush.msrb.mxu3 %v759_v3  ;;  %v327_v29 = vsub.f32 %v216_v16, %v2585_v20  ;;  %v3407_v3 = vand.u32 4294901760, %v2359_v26  ;;  %v3408_v16 = vand.u32 4294901760, %v2373_v39 }
  0x69   : > { %583 = vmatpush.msrb.mxu0 %v3404_v14  ;;  %628 = vmatpush.msrb.mxu1 %v2238_v11  ;;  %v781_v11 = vand.u32 4294901760, %v2563_v35  ;;  %v3406_v14 = vand.u32 4294901760, %v2345_v1  ;;  %v787_v58 = vand.u32 4294901760, %v2577_v10  ;;  %v793_v1 = vand.u32 4294901760, %v2592_v40 }
  0x6a   : > { %675 = vmatpush.msrb.mxu2 %v2472_v32  ;;  %766 = vmatpush.msrb.mxu3 %v765_v55  ;;  %v322_v55 = vand.u32 4294901760, %v321_v62 }
  0x6b   : > { %587 = vmatpush.msrb.mxu0 %v3405_v52  ;;  %630 = vmatpush.msrb.mxu1 %v2251_v17  ;;  %v777_v17 = vand.u32 4294901760, %v776_v25  ;;  %v2603_v52 = vsub.f32 %v236_v0, %v2583_v18  ;;  %v328_v0 = vand.u32 4294901760, %v327_v29  ;;  %v2622_v25 = vand.u32 4294901760, %v213_v7 }
  0x6c   : > { %677 = vmatpush.msrb.mxu2 %v2485_v15  ;;  %772 = vmatpush.msrb.mxu3 %v771_v22  ;;  %v3409_v22 = vand.u32 4294901760, %v2386_v50 }
  0x6d   : > { %591 = vmatpush.msrb.mxu0 %v3406_v14  ;;  %632 = vmatpush.msrb.mxu1 %v2259_v21  ;;  %v782_v21 = vsub.f32 %v2563_v35, %v781_v11  ;;  %v799_v26 = vand.u32 4294901760, %v2603_v52  ;;  %v329_v50 = vsub.f32 %v327_v29, %v328_v0  ;;  %v2639_v14 = vsub.f32 %v213_v7, %v2622_v25 }
  0x6e   : > { %679 = vmatpush.msrb.mxu2 %v2497_v37  ;;  %778 = vmatpush.msrb.mxu3 %v777_v17 }
  0x6f   : > { %595 = vmatpush.msrb.mxu0 %v3407_v3  ;;  %634 = vmatpush.msrb.mxu1 %v2271_v28  ;;  %v788_v28 = vsub.f32 %v2577_v10, %v787_v58  ;;  %v783_v39 = vand.u32 4294901760, %v782_v21  ;;  %v692_v17 = vand.u32 4294901760, %v2639_v14  ;;  %v3412_v3 = vand.u32 4294901760, %v2393_v56 }
  0x70   : > { %681 = vmatpush.msrb.mxu2 %v2510_v43  ;;  %323 = vmatmul.f32.vlgmr.msra.gmra.mxu0 %v322_v55 }
  0x71   : > { %599 = vmatpush.msrb.mxu0 %v3408_v16  ;;  %636 = vmatpush.msrb.mxu1 %v2289_v34  ;;  %v794_v34 = vsub.f32 %v2592_v40, %v793_v1  ;;  %v789_v62 = vand.u32 4294901760, %v788_v28  ;;  %v259_v16 = vld [vmem:[#allocation6 + $0x138] sm:$0xff] }
  0x72   : > { %490 = vmatmul.f32.vlgmr.msra.gmra.mxu2 %v2547_v36  ;;  %534 = vmatmul.f32.vlgmr.msra.gmra.mxu3 %v320_v41  ;;  %v3410_v36 = vand.u32 4294901760, %v2403_v6  ;;  %v330_v6 = vand.u32 4294901760, %v329_v50 }
  0x73   : > { %603 = vmatpush.msrb.mxu0 %v3409_v22  ;;  %638 = vmatpush.msrb.mxu1 %v2308_v45  ;;  %v800_v45 = vsub.f32 %v2603_v52, %v799_v26  ;;  %v795_v41 = vand.u32 4294901760, %v794_v34  ;;  %v258_v34 = vld [vmem:[#allocation6 + $0x130] sm:$0xff] }
  0x74   : > { %683 = vmatpush.msrb.mxu2 %v2539_v4  ;;  %784 = vmatpush.msrb.mxu3 %v783_v39 }
  0x75   : > { %607 = vmatpush.msrb.mxu0 %v3410_v36  ;;  %640 = vmatpush.msrb.mxu1 %v2318_v51  ;;  %v801_v51 = vand.u32 4294901760, %v800_v45  ;;  %v257_v45 = vld [vmem:[#allocation6 + $0x128] sm:$0xff] }
  0x76   : > { %685 = vmatpush.msrb.mxu2 %v2552_v5  ;;  %432 = vmatmul.f32.vlgmr.msra.gmra.mxu1 %v2523_v49 }
  0x77   : > { %814 = vmatpush.msra.mxu0 %v2378_v44  ;;  %642 = vmatpush.msrb.mxu1 %v2330_v57  ;;  %v3411_v57 = vand.u32 4294901760, %v2378_v44  ;;  %v217_v44 = vld [vmem:[%s2218_s18 + $0x28] sm:$0xff] }
  0x78   : > { %687 = vmatpush.msrb.mxu2 %v2565_v9  ;;  %790 = vmatpush.msrb.mxu3 %v789_v62  ;;  %v2671_v7 = vand.u32 4294901760, %v217_v44 }
  0x79   : > { %817 = vmatpush.msra.mxu0 %v2393_v56  ;;  %644 = vmatpush.msrb.mxu1 %v2341_v63  ;;  %v693_v63 = vsub.f32 %v2639_v14, %v692_v17  ;;  %v3415_v56 = vand.u32 4294901760, %v2422_v53 }
  0x7a   : > { %689 = vmatpush.msrb.mxu2 %v2583_v18  ;;  %796 = vmatpush.msrb.mxu3 %v795_v41  ;;  %v2822_v41 = vand.u32 4294901760, %v258_v34 }
  0x7b   : > { %495 = vmatmul.f32.gmra.mxu2 %v327_v29  ;;  %820 = vmatpush.msra.mxu0 %v2416_v38  ;;  %v3413_v29 = vld [vmem:[#allocation12_spill] sm:$0xff]  ;;  %v694_v21 = vand.u32 4294901760, %v693_v63 }
  0x7c   : > { %919 = vmatpush.msra.mxu2 %v3411_v57  ;;  %646 = vmatpush.msrb.mxu1 %v2355_v13  ;;  %v3414_v13 = vand.u32 4294901760, %v2416_v38  ;;  %v3418_v38 = vand.u32 4294901760, %v2470_v48 }
  0x7d   : > { %802 = vmatpush.msrb.mxu3 %v801_v51  ;;  %331 = vmatmul.f32.gmra.mxu0 %v330_v6  ;;  %v256_v6 = vld [vmem:[#allocation6 + $0x120] sm:$0xff] }
  0x7e   : > { %540 = vmatmul.f32.gmra.mxu3 %v328_v0  ;;  %823 = vmatpush.msra.mxu0 %v2422_v53  ;;  %v2682_v53 = vsub.f32 %v217_v44, %v2671_v7  ;;  %v255_v44 = vld [vmem:[#allocation6 + $0x118] sm:$0xff] }
  0x7f   : > { %923 = vmatpush.msra.mxu2 %v3412_v3  ;;  %990 = vmatpush.msra.mxu3 %v2352_v8  ;;  %v214_v3 = vld [vmem:[%s2218_s18 + $0x10] sm:$0xff] }
  0x80   : > { %648 = vmatpush.msrb.mxu1 %v3413_v29  ;;  %826 = vmatpush.msra.mxu0 %v2437_v46 }
  0x81   : > { %436 = vmatmul.f32.gmra.mxu1 %v2585_v20  ;;  %927 = vmatpush.msra.mxu2 %v3414_v13 }
  0x82   : > { %872 = vmatpush.msra.mxu1 %v2352_v8  ;;  %992 = vmatpush.msra.mxu3 %v2363_v31  ;;  %v3416_v8 = vand.u32 4294901760, %v2437_v46  ;;  %v700_v46 = vand.u32 4294901760, %v2682_v53 }
  0x83   : > { %829 = vmatpush.msra.mxu0 %v2457_v27  ;;  %931 = vmatpush.msra.mxu2 %v3415_v56  ;;  %v2845_v56 = vand.u32 4294901760, %v256_v6 }
  0x84   : > { %874 = vmatpush.msra.mxu1 %v2363_v31  ;;  %994 = vmatpush.msra.mxu3 %v2388_v54  ;;  %v3417_v31 = vand.u32 4294901760, %v2457_v27  ;;  %v3419_v27 = vand.u32 4294901760, %v2483_v2 }
  0x85   : > { %695 = vmatmul.f32.vlgmr.msrb.gmra.mxu2 %v694_v21  ;;  %832 = vmatpush.msra.mxu0 %v2470_v48 }
  0x86   : > { %876 = vmatpush.msra.mxu1 %v2388_v54  ;;  %935 = vmatpush.msra.mxu2 %v3416_v8  ;;  %v701_v54 = vsub.f32 %v2682_v53, %v700_v46  ;;  %v2848_v8 = vsub.f32 %v258_v34, %v2822_v41 }
  0x87   : > { %996 = vmatpush.msra.mxu3 %v2395_v59  ;;  %609 = vmatmul.f32.vlgmr.msrb.gmra.mxu0 %v2523_v49 }
  0x88   : > { %804 = vmatmul.f32.vlgmr.msrb.gmra.mxu3 %v2622_v25  ;;  %835 = vmatpush.msra.mxu0 %v2483_v2  ;;  %v266_v2 = vld [vmem:[#allocation6 + $0x170] sm:$0xff] }
  0x89   : > { %878 = vmatpush.msra.mxu1 %v2395_v59  ;;  %939 = vmatpush.msra.mxu2 %v3417_v31  ;;  %v3420_v59 = vand.u32 4294901760, %v2495_v60 }
  0x8a   : > { %998 = vmatpush.msra.mxu3 %v2408_v12  ;;  %650 = vmatmul.f32.vlgmr.msrb.gmra.mxu1 %v2523_v49 }
  0x8b   : > { %838 = vmatpush.msra.mxu0 %v2495_v60  ;;  %880 = vmatpush.msra.mxu1 %v2408_v12  ;;  %v3421_v12 = vand.u32 4294901760, %v2521_v23 }
  0x8c   : > { %943 = vmatpush.msra.mxu2 %v3418_v38  ;;  %1000 = vmatpush.msra.mxu3 %v2429_v47  ;;  %v254_v38 = vld [vmem:[#allocation6 + $0x110] sm:$0xff] }
  0x8d   : > { %841 = vmatpush.msra.mxu0 %v2508_v30  ;;  %882 = vmatpush.msra.mxu1 %v2429_v47  ;;  %v267_v47 = vld [vmem:[#allocation6 + $0x178] sm:$0xff] }
  0x8e   : > { %947 = vmatpush.msra.mxu2 %v3419_v27  ;;  %1002 = vmatpush.msra.mxu3 %v2444_v33  ;;  %v2720_v48 = vand.u32 4294901760, %v267_v47  ;;  %v2851_v27 = vand.u32 4294901760, %v214_v3 }
  0x8f   : > { %844 = vmatpush.msra.mxu0 %v2521_v23  ;;  %884 = vmatpush.msra.mxu1 %v2444_v33  ;;  %v702_v33 = vand.u32 4294901760, %v701_v54  ;;  %v263_v23 = vld [vmem:[#allocation6 + $0x158] sm:$0xff] }
  0x90   : > { %951 = vmatpush.msra.mxu2 %v3420_v59  ;;  %1004 = vmatpush.msra.mxu3 %v2459_v24  ;;  %v2735_v30 = vsub.f32 %v267_v47, %v2720_v48  ;;  %v2858_v59 = vand.u32 4294901760, %v255_v44 }
  0x91   : > { %847 = vmatpush.msra.mxu0 %v2534_v61  ;;  %886 = vmatpush.msra.mxu1 %v2459_v24  ;;  %v265_v24 = vld [vmem:[#allocation6 + $0x168] sm:$0xff] }
  0x92   : > { %955 = vmatpush.msra.mxu2 %v763_v19  ;;  %1006 = vmatpush.msra.mxu3 %v2472_v32  ;;  %v2732_v60 = vand.u32 4294901760, %v265_v24  ;;  %v2752_v19 = vand.u32 4294901760, %v263_v23  ;;  %v1081_v61 = vand.u32 4294901760, %v2735_v30 }
  0x93   : > { %613 = vmatmul.f32.gmra.mxu0 %v2585_v20  ;;  %888 = vmatpush.msra.mxu1 %v2472_v32  ;;  %v2727_v32 = vand.u32 4294901760, %v266_v2 }
  0x94   : > { %850 = vmatpush.msra.mxu0 %v2563_v35  ;;  %959 = vmatpush.msra.mxu2 %v3421_v12  ;;  %v262_v35 = vld [vmem:[#allocation6 + $0x150] sm:$0xff] }
  0x95   : > { %1008 = vmatpush.msra.mxu3 %v2485_v15  ;;  %890 = vmatpush.msra.mxu1 %v2485_v15  ;;  %v264_v15 = vld [vmem:[#allocation6 + $0x160] sm:$0xff]  ;;  %v2743_v49 = vsub.f32 %v266_v2, %v2727_v32 }
  0x96   : > { %853 = vmatpush.msra.mxu0 %v2577_v10  ;;  %963 = vmatpush.msra.mxu2 %v775_v42  ;;  %v2756_v42 = vsub.f32 %v265_v24, %v2732_v60  ;;  %v2766_v10 = vand.u32 4294901760, %v262_v35  ;;  %v2870_v24 = vand.u32 4294901760, %v254_v38 }
  0x97   : > { %1010 = vmatpush.msra.mxu3 %v2497_v37  ;;  %703 = vmatmul.f32.gmra.mxu2 %v702_v33 }
  0x98   : > { %856 = vmatpush.msra.mxu0 %v2592_v40  ;;  %892 = vmatpush.msra.mxu1 %v2497_v37  ;;  %v2748_v37 = vand.u32 4294901760, %v264_v15  ;;  %v1093_v40 = vand.u32 4294901760, %v2756_v42 }
  0x99   : > { %967 = vmatpush.msra.mxu2 %v781_v11  ;;  %1012 = vmatpush.msra.mxu3 %v2510_v43 }
  0x9a   : > { %808 = vmatmul.f32.gmra.mxu3 %v2671_v7  ;;  %859 = vmatpush.msra.mxu0 %v2603_v52  ;;  %v2769_v11 = vsub.f32 %v264_v15, %v2748_v37  ;;  %v1094_v22 = vsub.f32 %v2756_v42, %v1093_v40  ;;  %v3363_v15 = vand.u32 4294901760, %v2848_v8 }
  0x9b   : > { %894 = vmatpush.msra.mxu1 %v2510_v43  ;;  %971 = vmatpush.msra.mxu2 %v787_v58  ;;  %v1087_v43 = vand.u32 4294901760, %v2743_v49  ;;  %v260_v58 = vld [vmem:[#allocation6 + $0x140] sm:$0xff] }
  0x9c   : > { %1014 = vmatpush.msra.mxu3 %v2539_v4  ;;  %654 = vmatmul.f32.gmra.mxu1 %v2585_v20  ;;  %v261_v20 = vld [vmem:[#allocation6 + $0x148] sm:$0xff]  ;;  %v2790_v55 = vand.u32 4294901760, %v260_v58  ;;  %v3374_v28 = vand.u32 4294901760, %v2769_v11  ;;  %v1095_v51 = vand.u32 4294901760, %v1094_v22  ;;  %v252_v22 = vld [vmem:[#allocation6 + $0x100] sm:$0xff] }
  0x9d   : > { %862 = vmatmul.f32.vlgmr.msra.gmra.mxu0 %v2639_v14  ;;  %896 = vmatpush.msra.mxu1 %v2539_v4  ;;  %v1082_v4 = vsub.f32 %v2735_v30, %v1081_v61  ;;  %v1088_v52 = vsub.f32 %v2743_v49, %v1087_v43 }
  0x9e   : > { %1031 = vmatpush.msrb.mxu0 %v2720_v48  ;;  %975 = vmatpush.msra.mxu2 %v793_v1  ;;  %v2779_v1 = vsub.f32 %v263_v23, %v2752_v19  ;;  %v2814_v62 = vsub.f32 %v260_v58, %v2790_v55  ;;  %v1100_v50 = vsub.f32 %v2769_v11, %v3374_v28 }
  0x9f   : > { %1016 = vmatpush.msra.mxu3 %v2552_v5  ;;  %898 = vmatpush.msra.mxu1 %v2552_v5  ;;  %v2783_v5 = vand.u32 4294901760, %v261_v20  ;;  %v1083_v0 = vand.u32 4294901760, %v1082_v4  ;;  %v2874_v23 = vsub.f32 %v256_v6, %v2845_v56 }
  0xa0   : > { %1033 = vmatpush.msrb.mxu0 %v2727_v32  ;;  %979 = vmatpush.msra.mxu2 %v799_v26  ;;  %v2796_v26 = vsub.f32 %v262_v35, %v2766_v10  ;;  %v3371_v39 = vand.u32 4294901760, %v2779_v1  ;;  %v3366_v29 = vand.u32 4294901760, %v2814_v62  ;;  %v1101_v13 = vand.u32 4294901760, %v1100_v50 }
  0xa1   : > { %1018 = vmatpush.msra.mxu3 %v2565_v9  ;;  %981 = vmatmul.f32.vlgmr.msra.gmra.mxu2 %v2622_v25  ;;  %v2809_v36 = vsub.f32 %v261_v20, %v2783_v5  ;;  %v2880_v35 = vsub.f32 %v214_v3, %v2851_v27  ;;  %v3360_v34 = vand.u32 4294901760, %v2874_v23 }
  0xa2   : > { %1035 = vmatpush.msrb.mxu0 %v2732_v60  ;;  %1186 = vmatpush.msrb.mxu2 %v2735_v30  ;;  %v1106_v14 = vsub.f32 %v2779_v1, %v3371_v39  ;;  %v1124_v2 = vsub.f32 %v2814_v62, %v3366_v29 }
  0xa3   : > { %900 = vmatpush.msra.mxu1 %v2565_v9  ;;  %1020 = vmatpush.msra.mxu3 %v2583_v18  ;;  %v2806_v9 = vand.u32 4294901760, %v259_v16  ;;  %v3367_v57 = vand.u32 4294901760, %v2809_v36  ;;  %v3375_v50 = vand.u32 4294901760, %v2880_v35 }
  0xa4   : > { %1022 = vmatmul.f32.vlgmr.msra.gmra.mxu3 %v2622_v25  ;;  %1037 = vmatpush.msrb.mxu0 %v2748_v37  ;;  %v1089_v25 = vand.u32 4294901760, %v1088_v52  ;;  %v1107_v31 = vand.u32 4294901760, %v1106_v14  ;;  %v2888_v52 = vsub.f32 %v255_v44, %v2858_v59  ;;  %v2915_v44 = vand.u32 4294901760, %v252_v22 }
  0xa5   : > { %1189 = vmatpush.msrb.mxu2 %v2743_v49  ;;  %1244 = vmatpush.msrb.mxu3 %v2720_v48  ;;  %v2835_v63 = vsub.f32 %v259_v16, %v2806_v9  ;;  %v1118_v54 = vsub.f32 %v2809_v36, %v3367_v57  ;;  %v1136_v16 = vsub.f32 %v2848_v8, %v3363_v15 }
  0xa6   : > { %902 = vmatpush.msra.mxu1 %v2583_v18  ;;  %1039 = vmatpush.msrb.mxu0 %v2752_v19  ;;  %v3368_v18 = vand.u32 4294901760, %v2796_v26  ;;  %v3362_v6 = vand.u32 4294901760, %v2888_v52 }
  0xa7   : > { %906 = vmatmul.f32.vlgmr.msra.gmra.mxu1 %v692_v17  ;;  %1192 = vmatpush.msrb.mxu2 %v2756_v42  ;;  %v2831_v17 = vand.u32 4294901760, %v257_v45  ;;  %v3364_v47 = vand.u32 4294901760, %v2835_v63  ;;  %v1119_v20 = vand.u32 4294901760, %v1118_v54  ;;  %v274_v42 = vld [vmem:[#allocation6 + $0x1b0] sm:$0xff] }
  0xa8   : > { %1084 = vmatpush.msrb.mxu1 %v1083_v0  ;;  %1246 = vmatpush.msrb.mxu3 %v2727_v32  ;;  %v1112_v21 = vsub.f32 %v2796_v26, %v3368_v18  ;;  %v278_v18 = vld [vmem:[#allocation6 + $0x1d0] sm:$0xff] }
  0xa9   : > { %1041 = vmatpush.msrb.mxu0 %v2766_v10  ;;  %1195 = vmatpush.msrb.mxu2 %v2769_v11  ;;  %v2862_v33 = vsub.f32 %v257_v45, %v2831_v17  ;;  %v1130_v58 = vsub.f32 %v2835_v63, %v3364_v47  ;;  %v218_v45 = vld [vmem:[%s2218_s18 + $0x30] sm:$0xff] }
  0xaa   : > { %1090 = vmatpush.msrb.mxu1 %v1089_v25  ;;  %1248 = vmatpush.msrb.mxu3 %v2732_v60  ;;  %v1113_v12 = vand.u32 4294901760, %v1112_v21  ;;  %v2900_v25 = vsub.f32 %v254_v38, %v2870_v24  ;;  %v2917_v21 = vand.u32 4294901760, %v218_v45  ;;  %v1148_v38 = vsub.f32 %v2874_v23, %v3360_v34 }
  0xab   : > { %985 = vmatmul.f32.gmra.mxu2 %v2671_v7  ;;  %1043 = vmatpush.msrb.mxu0 %v2783_v5  ;;  %v3361_v4 = vand.u32 4294901760, %v2862_v33  ;;  %v2944_v34 = vsub.f32 %v252_v22, %v2915_v44 }
  0xac   : > { %1096 = vmatpush.msrb.mxu1 %v1095_v51  ;;  %1198 = vmatpush.msrb.mxu2 %v2779_v1  ;;  %v1131_v51 = vand.u32 4294901760, %v1130_v58 }
  0xad   : > { %1250 = vmatpush.msrb.mxu3 %v2748_v37  ;;  %867 = vmatmul.f32.gmra.mxu0 %v2682_v53  ;;  %v1125_v53 = vand.u32 4294901760, %v1124_v2  ;;  %v1142_v14 = vsub.f32 %v2862_v33, %v3361_v4  ;;  %v3365_v2 = vand.u32 4294901760, %v2900_v25  ;;  %v2947_v4 = vsub.f32 %v218_v45, %v2917_v21  ;;  %v279_v45 = vld [vmem:[#allocation6 + $0x1d8] sm:$0xff] }
  0xae   : > { %1026 = vmatmul.f32.gmra.mxu3 %v2671_v7  ;;  %1045 = vmatpush.msrb.mxu0 %v2790_v55  ;;  %v253_v7 = vld [vmem:[#allocation6 + $0x108] sm:$0xff]  ;;  %v3372_v29 = vand.u32 4294901760, %v2944_v34  ;;  %v2976_v57 = vand.u32 4294901760, %v279_v45 }
  0xaf   : > { %1102 = vmatpush.msrb.mxu1 %v1101_v13  ;;  %1201 = vmatpush.msrb.mxu2 %v2796_v26  ;;  %v2896_v0 = vand.u32 4294901760, %v253_v7  ;;  %v282_v13 = vld [vmem:[#allocation6 + $0x1f0] sm:$0xff]  ;;  %v1143_v58 = vand.u32 4294901760, %v1142_v14  ;;  %v1149_v14 = vand.u32 4294901760, %v1148_v38 }
  0xb0   : > { %1252 = vmatpush.msrb.mxu3 %v2752_v19  ;;  %912 = vmatmul.f32.gmra.mxu1 %v700_v46  ;;  %v283_v46 = vld [vmem:[#allocation6 + $0x1f8] sm:$0xff]  ;;  %v3001_v30 = vsub.f32 %v279_v45, %v2976_v57 }
  0xb1   : > { %1047 = vmatpush.msrb.mxu0 %v2806_v9  ;;  %1108 = vmatpush.msrb.mxu1 %v1107_v31  ;;  %v2911_v3 = vand.u32 4294901760, %v283_v46  ;;  %v1137_v31 = vand.u32 4294901760, %v1136_v16  ;;  %v2924_v54 = vsub.f32 %v253_v7, %v2896_v0  ;;  %v1154_v7 = vsub.f32 %v2888_v52, %v3362_v6 }
  0xb2   : > { %1204 = vmatpush.msrb.mxu2 %v2809_v36  ;;  %1254 = vmatpush.msrb.mxu3 %v2766_v10  ;;  %v2939_v16 = vand.u32 4294901760, %v282_v13 }
  0xb3   : > { %1049 = vmatpush.msrb.mxu0 %v2822_v41  ;;  %1114 = vmatpush.msrb.mxu1 %v1113_v12  ;;  %v1065_v12 = vsub.f32 %v2880_v35, %v3375_v50  ;;  %v3369_v6 = vand.u32 4294901760, %v2924_v54  ;;  %v1155_v47 = vand.u32 4294901760, %v1154_v7 }
  0xb4   : > { %1207 = vmatpush.msrb.mxu2 %v2814_v62  ;;  %1256 = vmatpush.msrb.mxu3 %v2783_v5  ;;  %v2961_v38 = vsub.f32 %v282_v13, %v2939_v16 }
  0xb5   : > { %1051 = vmatpush.msrb.mxu0 %v2831_v17  ;;  %1120 = vmatpush.msrb.mxu1 %v1119_v20  ;;  %v281_v20 = vld [vmem:[#allocation6 + $0x1e8] sm:$0xff]  ;;  %v1066_v22 = vand.u32 4294901760, %v1065_v12  ;;  %v3373_v12 = vand.u32 4294901760, %v2947_v4  ;;  %v1166_v7 = vsub.f32 %v2924_v54, %v3369_v6 }
  0xb6   : > { %1210 = vmatpush.msrb.mxu2 %v2835_v63  ;;  %1258 = vmatpush.msrb.mxu3 %v2790_v55  ;;  %v2954_v15 = vand.u32 4294901760, %v281_v20 }
  0xb7   : > { %1053 = vmatpush.msrb.mxu0 %v2845_v56  ;;  %1126 = vmatpush.msrb.mxu1 %v1125_v53  ;;  %v2937_v53 = vsub.f32 %v283_v46, %v2911_v3  ;;  %v1160_v46 = vsub.f32 %v2900_v25, %v3365_v2 }
  0xb8   : > { %1213 = vmatpush.msrb.mxu2 %v2848_v8  ;;  %1260 = vmatpush.msrb.mxu3 %v2806_v9  ;;  %v2974_v13 = vsub.f32 %v281_v20, %v2954_v15  ;;  %v277_v20 = vld [vmem:[#allocation6 + $0x1c8] sm:$0xff] }
  0xb9   : > { %1055 = vmatpush.msrb.mxu0 %v2858_v59  ;;  %1132 = vmatpush.msrb.mxu1 %v1131_v51  ;;  %v280_v51 = vld [vmem:[#allocation6 + $0x1e0] sm:$0xff] }
  0xba   : > { %1216 = vmatpush.msrb.mxu2 %v2862_v33  ;;  %1262 = vmatpush.msrb.mxu3 %v2822_v41  ;;  %v2963_v2 = vand.u32 4294901760, %v280_v51  ;;  %v3377_v39 = vand.u32 4294901760, %v2974_v13 }
  0xbb   : > { %1057 = vmatpush.msrb.mxu0 %v2870_v24  ;;  %1138 = vmatpush.msrb.mxu1 %v1137_v31  ;;  %v3370_v31 = vand.u32 4294901760, %v2937_v53 }
  0xbc   : > { %1219 = vmatpush.msrb.mxu2 %v2874_v23  ;;  %1264 = vmatpush.msrb.mxu3 %v2831_v17  ;;  %3422 = vst [vmem:[#allocation12_spill] sm:$0xff] %v2963_v2  ;;  %v2985_v6 = vsub.f32 %v280_v51, %v2963_v2  ;;  %v1167_v51 = vand.u32 4294901760, %v1166_v7  ;;  %v275_v7 = vld [vmem:[#allocation6 + $0x1b8] sm:$0xff] }
  0xbd   : > { %1059 = vmatpush.msrb.mxu0 %v2896_v0  ;;  %1144 = vmatpush.msrb.mxu1 %v1143_v58  ;;  %v1161_v58 = vand.u32 4294901760, %v1160_v46  ;;  %v3376_v46 = vand.u32 4294901760, %v2961_v38 }
  0xbe   : > { %1222 = vmatpush.msrb.mxu2 %v2888_v52  ;;  %1266 = vmatpush.msrb.mxu3 %v2845_v56  ;;  %v3378_v45 = vand.u32 4294901760, %v2985_v6 }
  0xbf   : > { %1061 = vmatpush.msrb.mxu0 %v2915_v44  ;;  %1150 = vmatpush.msrb.mxu1 %v1149_v14  ;;  %v1454_v14 = vsub.f32 %v2937_v53, %v3370_v31  ;;  %v2996_v31 = vand.u32 4294901760, %v278_v18 }
  0xc0   : > { %1225 = vmatpush.msrb.mxu2 %v2900_v25  ;;  %1268 = vmatpush.msrb.mxu3 %v2858_v59 }
  0xc1   : > { %1067 = vmatmul.f32.vlgmr.msrb.gmra.mxu0 %v1066_v22  ;;  %1156 = vmatpush.msrb.mxu1 %v1155_v47  ;;  %v1172_v22 = vsub.f32 %v2944_v34, %v3372_v29  ;;  %v1073_v47 = vsub.f32 %v2947_v4, %v3373_v12  ;;  %v3006_v29 = vand.u32 4294901760, %v277_v20  ;;  %v1455_v12 = vand.u32 4294901760, %v1454_v14 }
  0xc2   : > { %1291 = vmatpush.msra.mxu0 %v1081_v61  ;;  %1228 = vmatpush.msrb.mxu2 %v2924_v54  ;;  %v276_v61 = vld [vmem:[#allocation6 + $0x1c0] sm:$0xff]  ;;  %v3018_v28 = vsub.f32 %v278_v18, %v2996_v31  ;;  %v1466_v14 = vsub.f32 %v2974_v13, %v3377_v39  ;;  %v1472_v39 = vsub.f32 %v2985_v6, %v3378_v45 }
  0xc3   : > { %1270 = vmatpush.msrb.mxu3 %v2870_v24  ;;  %1162 = vmatpush.msrb.mxu1 %v1161_v58  ;;  %v1460_v58 = vsub.f32 %v2961_v38, %v3376_v46  ;;  %v1173_v49 = vand.u32 4294901760, %v1172_v22  ;;  %v3020_v50 = vand.u32 4294901760, %v276_v61  ;;  %v3424_v22 = vand.u32 4294901760, %v2769_v11  ;;  %v273_v46 = vld [vmem:[#allocation6 + $0x1a8] sm:$0xff]  ;;  %v272_v45 = vld [vmem:[#allocation6 + $0x1a0] sm:$0xff] }
  0xc4   : > { %1295 = vmatpush.msra.mxu0 %v1087_v43  ;;  %1231 = vmatpush.msrb.mxu2 %v2944_v34  ;;  %v1074_v43 = vand.u32 4294901760, %v1073_v47  ;;  %v3032_v18 = vsub.f32 %v277_v20, %v3006_v29  ;;  %v3034_v47 = vand.u32 4294901760, %v275_v7  ;;  %v3044_v20 = vand.u32 4294901760, %v274_v42 }
  0xc5   : > { %1272 = vmatpush.msrb.mxu3 %v2896_v0  ;;  %1234 = vmatmul.f32.vlgmr.msrb.gmra.mxu2 %v2880_v35  ;;  %v3042_v11 = vsub.f32 %v276_v61, %v3020_v50  ;;  %v3071_v61 = vand.u32 4294901760, %v272_v45 }
  0xc6   : > { %1299 = vmatpush.msra.mxu0 %v1093_v40  ;;  %1403 = vmatpush.msra.mxu2 %v2911_v3  ;;  %v3423_v40 = vand.u32 4294901760, %v2880_v35  ;;  %v3379_v35 = vand.u32 4294901760, %v3018_v28 }
  0xc7   : > { %1168 = vmatpush.msrb.mxu1 %v1167_v51  ;;  %1274 = vmatpush.msrb.mxu3 %v2915_v44  ;;  %v1461_v51 = vand.u32 4294901760, %v1460_v58  ;;  %v3426_v58 = vand.u32 4294901760, %v3001_v30 }
  0xc8   : > { %1278 = vmatmul.f32.vlgmr.msrb.gmra.mxu3 %v3423_v40  ;;  %1303 = vmatpush.msra.mxu0 %v3424_v22  ;;  %v3425_v40 = vand.u32 4294901760, %v2779_v1  ;;  %v3427_v1 = vand.u32 4294901760, %v2796_v26 }
  0xc9   : > { %1405 = vmatpush.msra.mxu2 %v2939_v16  ;;  %1456 = vmatpush.msra.mxu3 %v1455_v12  ;;  %v1467_v12 = vand.u32 4294901760, %v1466_v14  ;;  %v1478_v22 = vsub.f32 %v3001_v30, %v3426_v58  ;;  %v1473_v14 = vand.u32 4294901760, %v1472_v39  ;;  %v3382_v58 = vand.u32 4294901760, %v3042_v11 }
  0xca   : > { %1174 = vmatpush.msrb.mxu1 %v1173_v49  ;;  %1075 = vmatmul.f32.gmra.mxu0 %v1074_v43  ;;  %v3056_v49 = vsub.f32 %v275_v7, %v3034_v47  ;;  %v3058_v43 = vand.u32 4294901760, %v273_v46  ;;  %v3069_v7 = vsub.f32 %v274_v42, %v3044_v20  ;;  %v3428_v39 = vand.u32 4294901760, %v2809_v36 }
  0xcb   : > { %1176 = vmatmul.f32.vlgmr.msrb.gmra.mxu1 %v2851_v27  ;;  %1307 = vmatpush.msra.mxu0 %v3425_v40  ;;  %v271_v40 = vld [vmem:[#allocation6 + $0x198] sm:$0xff]  ;;  %v1479_v26 = vand.u32 4294901760, %v1478_v22  ;;  %v3430_v36 = vand.u32 4294901760, %v2947_v4 }
  0xcc   : > { %1362 = vmatpush.msra.mxu1 %v2720_v48  ;;  %1407 = vmatpush.msra.mxu2 %v2954_v15  ;;  %v1484_v48 = vsub.f32 %v3018_v28, %v3379_v35  ;;  %v3082_v42 = vsub.f32 %v273_v46, %v3058_v43  ;;  %v3084_v35 = vand.u32 4294901760, %v271_v40  ;;  %v3383_v46 = vand.u32 4294901760, %v3069_v7 }
  0xcd   : > { %1462 = vmatpush.msra.mxu3 %v1461_v51  ;;  %1311 = vmatpush.msra.mxu0 %v3427_v1  ;;  %v269_v1 = vld [vmem:[#allocation6 + $0x188] sm:$0xff] }
  0xce   : > { %1364 = vmatpush.msra.mxu1 %v2727_v32  ;;  %1409 = vmatpush.msra.mxu2 %v2963_v2  ;;  %v3429_v32 = vand.u32 4294901760, %v3032_v18  ;;  %v1485_v22 = vand.u32 4294901760, %v1484_v48  ;;  %v215_v2 = vld [vmem:[%s2218_s18 + $0x18] sm:$0xff] }
  0xcf   : > { %1468 = vmatpush.msra.mxu3 %v1467_v12  ;;  %1239 = vmatmul.f32.gmra.mxu2 %v2947_v4  ;;  %v270_v12 = vld [vmem:[#allocation6 + $0x190] sm:$0xff] }
  0xd0   : > { %1315 = vmatpush.msra.mxu0 %v3428_v39  ;;  %1366 = vmatpush.msra.mxu1 %v2732_v60  ;;  %v1490_v51 = vsub.f32 %v3032_v18, %v3429_v32  ;;  %v3431_v60 = vand.u32 4294901760, %v2814_v62  ;;  %v1496_v39 = vsub.f32 %v3042_v11, %v3382_v58  ;;  %v3096_v32 = vsub.f32 %v272_v45, %v3071_v61 }
  0xd1   : > { %1411 = vmatpush.msra.mxu2 %v2976_v57  ;;  %1474 = vmatpush.msra.mxu3 %v1473_v14  ;;  %v3101_v4 = vand.u32 4294901760, %v270_v12  ;;  %v3432_v14 = vand.u32 4294901760, %v3056_v49  ;;  %v3109_v45 = vsub.f32 %v271_v40, %v3084_v35  ;;  %v3114_v58 = vand.u32 4294901760, %v269_v1 }
  0xd2   : > { %1284 = vmatmul.f32.gmra.mxu3 %v3430_v36  ;;  %1319 = vmatpush.msra.mxu0 %v3431_v60  ;;  %v1491_v62 = vand.u32 4294901760, %v1490_v51  ;;  %v268_v60 = vld [vmem:[#allocation6 + $0x180] sm:$0xff]  ;;  %v1497_v51 = vand.u32 4294901760, %v1496_v39  ;;  %v1519_v40 = vand.u32 4294901760, %v3096_v32  ;;  %v3434_v36 = vand.u32 4294901760, %v2848_v8 }
  0xd3   : > { %1368 = vmatpush.msra.mxu1 %v2748_v37  ;;  %1413 = vmatpush.msra.mxu2 %v2996_v31  ;;  %v1502_v48 = vsub.f32 %v3056_v49, %v3432_v14  ;;  %v3433_v37 = vand.u32 4294901760, %v2835_v63  ;;  %v1508_v14 = vsub.f32 %v3069_v7, %v3383_v46  ;;  %v3129_v63 = vand.u32 4294901760, %v268_v60 }
  0xd4   : > { %1480 = vmatpush.msra.mxu3 %v1479_v26  ;;  %1180 = vmatmul.f32.gmra.mxu1 %v2917_v21  ;;  %v3116_v26 = vand.u32 4294901760, %v215_v2  ;;  %v3435_v39 = vand.u32 4294901760, %v3082_v42  ;;  %v1525_v46 = vand.u32 4294901760, %v3109_v45  ;;  %v3436_v8 = vand.u32 4294901760, %v2862_v33 }
  0xd5   : > { %1323 = vmatpush.msra.mxu0 %v3433_v37  ;;  %1370 = vmatpush.msra.mxu1 %v2752_v19  ;;  %v3127_v19 = vsub.f32 %v270_v12, %v3101_v4  ;;  %v3437_v33 = vand.u32 4294901760, %v2874_v23 }
  0xd6   : > { %1415 = vmatpush.msra.mxu2 %v3006_v29  ;;  %1486 = vmatpush.msra.mxu3 %v1485_v22  ;;  %v1503_v22 = vand.u32 4294901760, %v1502_v48  ;;  %v1514_v37 = vsub.f32 %v3082_v42, %v3435_v39  ;;  %v3143_v12 = vsub.f32 %v215_v2, %v3116_v26  ;;  %v1520_v48 = vsub.f32 %v3096_v32, %v1519_v40 }
  0xd7   : > { %1327 = vmatpush.msra.mxu0 %v3434_v36  ;;  %1372 = vmatpush.msra.mxu1 %v2766_v10  ;;  %v3140_v10 = vsub.f32 %v269_v1, %v3114_v58  ;;  %v3154_v1 = vsub.f32 %v268_v60, %v3129_v63  ;;  %v1526_v36 = vsub.f32 %v3109_v45, %v1525_v46 }
  0xd8   : > { %1417 = vmatpush.msra.mxu2 %v3020_v50  ;;  %1492 = vmatpush.msra.mxu3 %v1491_v62  ;;  %v1509_v62 = vand.u32 4294901760, %v1508_v14  ;;  %v1515_v2 = vand.u32 4294901760, %v1514_v37  ;;  %v3438_v14 = vand.u32 4294901760, %v2888_v52  ;;  %v1436_v23 = vand.u32 4294901760, %v3143_v12 }
  0xd9   : > { %1331 = vmatpush.msra.mxu0 %v3436_v8  ;;  %1374 = vmatpush.msra.mxu1 %v2783_v5  ;;  %v1531_v5 = vand.u32 4294901760, %v3127_v19  ;;  %v1521_v60 = vand.u32 4294901760, %v1520_v48  ;;  %v1543_v39 = vand.u32 4294901760, %v3154_v1  ;;  %v1527_v37 = vand.u32 4294901760, %v1526_v36 }
  0xda   : > { %1419 = vmatpush.msra.mxu2 %v3034_v47  ;;  %1498 = vmatpush.msra.mxu3 %v1497_v51  ;;  %v219_v51 = vld [vmem:[%s2218_s18 + $0x38] sm:$0xff]  ;;  %v3440_v8 = vand.u32 4294901760, %v2924_v54  ;;  %v3443_v36 = vand.u32 4294901760, %v2961_v38 }
  0xdb   : > { %1335 = vmatpush.msra.mxu0 %v3437_v33  ;;  %1376 = vmatpush.msra.mxu1 %v2790_v55  ;;  %v1537_v55 = vand.u32 4294901760, %v3140_v10  ;;  %v1532_v52 = vsub.f32 %v3127_v19, %v1531_v5 }
  0xdc   : > { %1421 = vmatpush.msra.mxu2 %v3044_v20  ;;  %1504 = vmatpush.msra.mxu3 %v1503_v22  ;;  %v3439_v22 = vand.u32 4294901760, %v2900_v25  ;;  %v1437_v25 = vsub.f32 %v3143_v12, %v1436_v23 }
  0xdd   : > { %1339 = vmatpush.msra.mxu0 %v3438_v14  ;;  %1378 = vmatpush.msra.mxu1 %v2806_v9  ;;  %v3174_v9 = vand.u32 4294901760, %v219_v51  ;;  %v1533_v54 = vand.u32 4294901760, %v1532_v52 }
  0xde   : > { %1423 = vmatpush.msra.mxu2 %v3058_v43  ;;  %1510 = vmatpush.msra.mxu3 %v1509_v62  ;;  %v3441_v62 = vand.u32 4294901760, %v2944_v34  ;;  %v1438_v34 = vand.u32 4294901760, %v1437_v25 }
  0xdf   : > { %1343 = vmatpush.msra.mxu0 %v3439_v22  ;;  %1380 = vmatpush.msra.mxu1 %v2822_v41  ;;  %v1538_v41 = vsub.f32 %v3140_v10, %v1537_v55  ;;  %v3194_v48 = vsub.f32 %v219_v51, %v3174_v9 }
  0xe0   : > { %1425 = vmatpush.msra.mxu2 %v3071_v61  ;;  %1516 = vmatpush.msra.mxu3 %v1515_v2 }
  0xe1   : > { %1347 = vmatpush.msra.mxu0 %v3440_v8  ;;  %1382 = vmatpush.msra.mxu1 %v2831_v17  ;;  %v1544_v17 = vsub.f32 %v3154_v1, %v1543_v39  ;;  %v1539_v33 = vand.u32 4294901760, %v1538_v41  ;;  %v1444_v2 = vand.u32 4294901760, %v3194_v48 }
  0xe2   : > { %1427 = vmatpush.msra.mxu2 %v3084_v35  ;;  %1522 = vmatpush.msra.mxu3 %v1521_v60 }
  0xe3   : > { %1351 = vmatpush.msra.mxu0 %v3441_v62  ;;  %1384 = vmatpush.msra.mxu1 %v2845_v56  ;;  %v1545_v56 = vand.u32 4294901760, %v1544_v17 }
  0xe4   : > { %1429 = vmatpush.msra.mxu2 %v3101_v4  ;;  %1528 = vmatpush.msra.mxu3 %v1527_v37 }
  0xe5   : > { %1353 = vmatmul.f32.vlgmr.msra.gmra.mxu0 %v2851_v27  ;;  %1386 = vmatpush.msra.mxu1 %v2858_v59  ;;  %v3442_v59 = vand.u32 4294901760, %v2937_v53 }
  0xe6   : > { %1558 = vmatpush.msrb.mxu0 %v2937_v53  ;;  %1431 = vmatpush.msra.mxu2 %v3114_v58  ;;  %v3444_v53 = vand.u32 4294901760, %v2974_v13 }
  0xe7   : > { %1534 = vmatpush.msra.mxu3 %v1533_v54  ;;  %1388 = vmatpush.msra.mxu1 %v2870_v24  ;;  %v1445_v24 = vsub.f32 %v3194_v48, %v1444_v2 }
  0xe8   : > { %1561 = vmatpush.msrb.mxu0 %v2961_v38  ;;  %1433 = vmatpush.msra.mxu2 %v3129_v63 }
  0xe9   : > { %1540 = vmatpush.msra.mxu3 %v1539_v33  ;;  %1439 = vmatmul.f32.vlgmr.msra.gmra.mxu2 %v1438_v34 }
  0xea   : > { %1564 = vmatpush.msrb.mxu0 %v2974_v13  ;;  %1663 = vmatpush.msrb.mxu2 %v3442_v59 }
  0xeb   : > { %1390 = vmatpush.msra.mxu1 %v2896_v0  ;;  %1546 = vmatpush.msra.mxu3 %v1545_v56  ;;  %v1446_v0 = vand.u32 4294901760, %v1445_v24 }
  0xec   : > { %1548 = vmatmul.f32.vlgmr.msra.gmra.mxu3 %v3116_v26  ;;  %1567 = vmatpush.msrb.mxu0 %v2985_v6 }
  0xed   : > { %1667 = vmatpush.msrb.mxu2 %v3443_v36  ;;  %1734 = vmatpush.msrb.mxu3 %v2911_v3 }
  0xee   : > { %1392 = vmatpush.msra.mxu1 %v2915_v44  ;;  %1357 = vmatmul.f32.gmra.mxu0 %v2917_v21  ;;  %v3445_v44 = vand.u32 4294901760, %v2985_v6  ;;  %v3448_v6 = vand.u32 4294901760, %v3018_v28 }
  0xef   : > { %1394 = vmatmul.f32.vlgmr.msra.gmra.mxu1 %v2851_v27  ;;  %1570 = vmatpush.msrb.mxu0 %v3001_v30  ;;  %v3446_v27 = vand.u32 4294901760, %v3001_v30 }
  0xf0   : > { %1616 = vmatpush.msrb.mxu1 %v2911_v3  ;;  %1671 = vmatpush.msrb.mxu2 %v3444_v53  ;;  %v3447_v3 = vld [vmem:[#allocation12_spill] sm:$0xff] }
  0xf1   : > { %1736 = vmatpush.msrb.mxu3 %v2939_v16  ;;  %1573 = vmatpush.msrb.mxu0 %v3018_v28  ;;  %v3450_v28 = vand.u32 4294901760, %v3042_v11 }
  0xf2   : > { %1618 = vmatpush.msrb.mxu1 %v2939_v16  ;;  %1675 = vmatpush.msrb.mxu2 %v3445_v44 }
  0xf3   : > { %1738 = vmatpush.msrb.mxu3 %v2954_v15  ;;  %1447 = vmatmul.f32.gmra.mxu2 %v1446_v0  ;;  %v433_v16 = vpop.f32.mrf.mxu1 }
  0xf4   : > { %1576 = vmatpush.msrb.mxu0 %v3032_v18  ;;  %1620 = vmatpush.msrb.mxu1 %v2954_v15  ;;  %v3449_v15 = vand.u32 4294901760, %v3032_v18 }
  0xf5   : > { %1679 = vmatpush.msrb.mxu2 %v3446_v27  ;;  %1740 = vmatpush.msrb.mxu3 %v3447_v3  ;;  %v535_v13 = vpop.f32.mrf.mxu3 }
  0xf6   : > { %1552 = vmatmul.f32.gmra.mxu3 %v3174_v9  ;;  %1579 = vmatpush.msrb.mxu0 %v3042_v11 }
  0xf7   : > { %1622 = vmatpush.msrb.mxu1 %v3447_v3  ;;  %1683 = vmatpush.msrb.mxu2 %v3448_v6 }
  0xf8   : > { %1742 = vmatpush.msrb.mxu3 %v2976_v57  ;;  %1398 = vmatmul.f32.gmra.mxu1 %v2917_v21  ;;  %v3452_v21 = vand.u32 4294901760, %v3069_v7 }
  0xf9   : > { %1582 = vmatpush.msrb.mxu0 %v3056_v49  ;;  %1624 = vmatpush.msrb.mxu1 %v2976_v57  ;;  %v3451_v57 = vand.u32 4294901760, %v3056_v49 }
  0xfa   : > { %1687 = vmatpush.msrb.mxu2 %v3449_v15  ;;  %1744 = vmatpush.msrb.mxu3 %v2996_v31 }
  0xfb   : > { %1585 = vmatpush.msrb.mxu0 %v3069_v7  ;;  %1626 = vmatpush.msrb.mxu1 %v2996_v31  ;;  %v491_v31 = vpop.f32.mrf.mxu2 }
  0xfc   : > { %1691 = vmatpush.msrb.mxu2 %v3450_v28  ;;  %1746 = vmatpush.msrb.mxu3 %v3006_v29 }
  0xfd   : > { %1588 = vmatpush.msrb.mxu0 %v3082_v42  ;;  %1628 = vmatpush.msrb.mxu1 %v3006_v29  ;;  %v3453_v29 = vand.u32 4294901760, %v3082_v42 }
  0xfe   : > { %1695 = vmatpush.msrb.mxu2 %v3451_v57  ;;  %1748 = vmatpush.msrb.mxu3 %v3020_v50  ;;  %v437_v30 = vpop.f32.mrf.mxu1 }
  0xff   : > { %1591 = vmatpush.msrb.mxu0 %v3096_v32  ;;  %1630 = vmatpush.msrb.mxu1 %v3020_v50  ;;  %v324_v50 = vpop.f32.mrf.mxu0 }
 0x100   : > { %1699 = vmatpush.msrb.mxu2 %v3452_v21  ;;  %1750 = vmatpush.msrb.mxu3 %v3034_v47 }
 0x101   : > { %1594 = vmatpush.msrb.mxu0 %v3109_v45  ;;  %1632 = vmatpush.msrb.mxu1 %v3034_v47 }
 0x102   : > { %1703 = vmatpush.msrb.mxu2 %v3453_v29  ;;  %1752 = vmatpush.msrb.mxu3 %v3044_v20 }
 0x103   : > { %1597 = vmatpush.msrb.mxu0 %v3127_v19  ;;  %1634 = vmatpush.msrb.mxu1 %v3044_v20  ;;  %v496_v18 = vpop.f32.mrf.mxu2  ;;  %v285_v20 = vstv %s284_s19 }
 0x104   : > { %1707 = vmatpush.msrb.mxu2 %v1519_v40  ;;  %1754 = vmatpush.msrb.mxu3 %v3058_v43 }
 0x105   : > { %1600 = vmatpush.msrb.mxu0 %v3140_v10  ;;  %1636 = vmatpush.msrb.mxu1 %v3058_v43  ;;  %v325_v43 = vadd.f32 %v324_v50, %v285_v20 }
 0x106   : > { %1711 = vmatpush.msrb.mxu2 %v1525_v46  ;;  %1756 = vmatpush.msrb.mxu3 %v3071_v61 }
 0x107   : > { %1603 = vmatpush.msrb.mxu0 %v3154_v1  ;;  %1638 = vmatpush.msrb.mxu1 %v3071_v61  ;;  %v332_v38 = vpop.f32.mrf.mxu0  ;;  %v651_v11 = vpop.f32.mrf.mxu1  ;;  %v434_v42 = vadd.f32 %v433_v16, %v325_v43 }
 0x108   : > { %1715 = vmatpush.msrb.mxu2 %v1531_v5  ;;  %1758 = vmatpush.msrb.mxu3 %v3084_v35  ;;  %v333_v46 = vadd.f32 %v332_v38, %v285_v20 }
 0x109   : > { %1606 = vmatmul.f32.vlgmr.msrb.gmra.mxu0 %v3143_v12  ;;  %1640 = vmatpush.msrb.mxu1 %v3084_v35  ;;  %v541_v35 = vpop.f32.mrf.mxu3 }
 0x10a   : > { %1719 = vmatpush.msrb.mxu2 %v1537_v55  ;;  %1760 = vmatpush.msrb.mxu3 %v3101_v4  ;;  %v438_v45 = vadd.f32 %v437_v30, %v333_v46 }
 0x10b   : > { %1642 = vmatpush.msrb.mxu1 %v3101_v4  ;;  %v696_v61 = vpop.f32.mrf.mxu2  ;;  %v492_v4 = vadd.f32 %v491_v31, %v434_v42 }
 0x10c   : > { %1723 = vmatpush.msrb.mxu2 %v1543_v39  ;;  %1762 = vmatpush.msrb.mxu3 %v3114_v58 }
 0x10d   : > { %1725 = vmatmul.f32.vlgmr.msrb.gmra.mxu2 %v3116_v26  ;;  %1644 = vmatpush.msrb.mxu1 %v3114_v58  ;;  %v536_v19 = vadd.f32 %v535_v13, %v492_v4 }
 0x10e   : > { %1764 = vmatpush.msrb.mxu3 %v3129_v63 }
 0x10f   : > { %1766 = vmatmul.f32.vlgmr.msrb.gmra.mxu3 %v3116_v26  ;;  %1646 = vmatpush.msrb.mxu1 %v3129_v63  ;;  %v610_v47 = vpop.f32.mrf.mxu0  ;;  %v497_v63 = vadd.f32 %v496_v18, %v438_v45 }
 0x110   : > { %1650 = vmatmul.f32.vlgmr.msrb.gmra.mxu1 %v1436_v23  ;;  %v611_v5 = vadd.f32 %v610_v47, %v536_v19 }
 0x111   : > { %1611 = vmatmul.f32.gmra.mxu0 %v3194_v48  ;;  %v805_v58 = vpop.f32.mrf.mxu3  ;;  %v542_v12 = vadd.f32 %v541_v35, %v497_v63 }
 0x112   : > { %v652_v55 = vadd.f32 %v651_v11, %v611_v5 }
 0x114   : > { %v697_v22 = vadd.f32 %v696_v61, %v652_v55 }
 0x115   : > { %1729 = vmatmul.f32.gmra.mxu2 %v3174_v9 }
 0x116   : > { %v806_v37 = vadd.f32 %v805_v58, %v697_v22 }
 0x117   : > { %1770 = vmatmul.f32.gmra.mxu3 %v3174_v9  ;;  %v614_v49 = vpop.f32.mrf.mxu0 }
 0x118   : > { %1656 = vmatmul.f32.gmra.mxu1 %v1444_v2  ;;  %v615_v23 = vadd.f32 %v614_v49, %v542_v12 }
 0x119   : > { %v655_v7 = vpop.f32.mrf.mxu1 }
 0x11a   : > { %v704_v32 = vpop.f32.mrf.mxu2  ;;  %v656_v52 = vadd.f32 %v655_v7, %v615_v23 }
 0x11c   : > { %v705_v8 = vadd.f32 %v704_v32, %v656_v52 }
 0x11d   : > { %v809_v26 = vpop.f32.mrf.mxu3 }
 0x11e   : > { %v810_v54 = vadd.f32 %v809_v26, %v705_v8 }
 0x11f   : > { %v863_v40 = vpop.f32.mrf.mxu0 }
 0x120   : > { %v864_v25 = vadd.f32 %v863_v40, %v806_v37 }
 0x124   : > { %v907_v10 = vpop.f32.mrf.mxu1  ;;  %v982_v1 = vpop.f32.mrf.mxu2 }
 0x125   : > { %v908_v17 = vadd.f32 %v907_v10, %v864_v25 }
 0x127   : > { %v1023_v14 = vpop.f32.mrf.mxu3  ;;  %v983_v34 = vadd.f32 %v982_v1, %v908_v17 }
 0x129   : > { %v1024_v59 = vadd.f32 %v1023_v14, %v983_v34 }
 0x12a   : > { %v868_v51 = vpop.f32.mrf.mxu0 }
 0x12b   : > { %v869_v56 = vadd.f32 %v868_v51, %v810_v54 }
 0x12d   : > { %v913_v60 = vpop.f32.mrf.mxu1 }
 0x12e   : > { %v986_v9 = vpop.f32.mrf.mxu2  ;;  %v914_v24 = vadd.f32 %v913_v60, %v869_v56 }
 0x130   : > { %v987_v44 = vadd.f32 %v986_v9, %v914_v24 }
 0x131   : > { %v1027_v41 = vpop.f32.mrf.mxu3 }
 0x132   : > { %v1028_v15 = vadd.f32 %v1027_v41, %v987_v44 }
 0x13e   : > { %v1068_v39 = vpop.f32.mrf.mxu0 }
 0x13f   : > { %v1069_v0 = vadd.f32 %v1068_v39, %v1024_v59 }
 0x147   : > { %v1076_v33 = vpop.f32.mrf.mxu0 }
 0x148   : > { %v1177_v62 = vpop.f32.mrf.mxu1  ;;  %v1235_v48 = vpop.f32.mrf.mxu2  ;;  %v1077_v21 = vadd.f32 %v1076_v33, %v1028_v15 }
 0x149   : > { %v1178_v27 = vadd.f32 %v1177_v62, %v1069_v0 }
 0x14b   : > { %v1279_v2 = vpop.f32.mrf.mxu3  ;;  %v1236_v28 = vadd.f32 %v1235_v48, %v1178_v27 }
 0x14d   : > { %v1280_v29 = vadd.f32 %v1279_v2, %v1236_v28 }
 0x151   : > { %v1181_v36 = vpop.f32.mrf.mxu1 }
 0x152   : > { %v1240_v3 = vpop.f32.mrf.mxu2  ;;  %v1182_v50 = vadd.f32 %v1181_v36, %v1077_v21 }
 0x154   : > { %v1241_v30 = vadd.f32 %v1240_v3, %v1182_v50 }
 0x155   : > { %v1285_v6 = vpop.f32.mrf.mxu3 }
 0x156   : > { %v1286_v35 = vadd.f32 %v1285_v6, %v1241_v30 }
 0x162   : > { %v1354_v53 = vpop.f32.mrf.mxu0 }
 0x163   : > { %v1355_v38 = vadd.f32 %v1354_v53, %v1280_v29 }
 0x16b   : > { %v1358_v31 = vpop.f32.mrf.mxu0 }
 0x16c   : > { %v1395_v57 = vpop.f32.mrf.mxu1  ;;  %v1440_v16 = vpop.f32.mrf.mxu2  ;;  %v1359_v61 = vadd.f32 %v1358_v31, %v1286_v35 }
 0x16d   : > { %v1396_v18 = vadd.f32 %v1395_v57, %v1355_v38 }
 0x16f   : > { %v1549_v13 = vpop.f32.mrf.mxu3  ;;  %v1441_v11 = vadd.f32 %v1440_v16, %v1396_v18 }
 0x171   : > { %v1550_v43 = vadd.f32 %v1549_v13, %v1441_v11 }
 0x175   : > { %v1399_v47 = vpop.f32.mrf.mxu1 }
 0x176   : > { %v1448_v49 = vpop.f32.mrf.mxu2  ;;  %v1400_v58 = vadd.f32 %v1399_v47, %v1359_v61 }
 0x178   : > { %v1449_v32 = vadd.f32 %v1448_v49, %v1400_v58 }
 0x179   : > { %v1553_v7 = vpop.f32.mrf.mxu3 }
 0x17a   : > { %v1554_v19 = vadd.f32 %v1553_v7, %v1449_v32 }
 0x186   : > { %v1607_v20 = vpop.f32.mrf.mxu0 }
 0x187   : > { %v1608_v42 = vadd.f32 %v1607_v20, %v1550_v43 }
 0x18d   : > { %v1651_v46 = vpop.f32.mrf.mxu1 }
 0x18e   : > { %v1652_v4 = vadd.f32 %v1651_v46, %v1608_v42  ;;  %v1612_v26 = vpop.f32.mrf.mxu0 }
 0x18f   : > { %v1613_v12 = vadd.f32 %v1612_v26, %v1554_v19 }
 0x190   : > { %v1726_v45 = vpop.f32.mrf.mxu2 }
 0x191   : > { %v1727_v40 = vadd.f32 %v1726_v45, %v1652_v4 }
 0x192   : > { %v1767_v63 = vpop.f32.mrf.mxu3 }
 0x193   : > { %v1768_v10 = vadd.f32 %v1767_v63, %v1727_v40 }
 0x195   : > { %1774 = vst [vmem:[%s209_s25] sm:$0xff] %v1768_v10  ;;  %v1657_v5 = vpop.f32.mrf.mxu1 }
 0x196   : > { %v1658_v1 = vadd.f32 %v1657_v5, %v1613_v12 }
 0x198   : > { %v1730_v51 = vpop.f32.mrf.mxu2 }
 0x199   : > { %v1731_v14 = vadd.f32 %v1730_v51, %v1658_v1 }
 0x19a   : > { %v1771_v55 = vpop.f32.mrf.mxu3 }
 0x19b   : > { %v1772_v23 = vadd.f32 %v1771_v55, %v1731_v14 }
 0x19d   : > { %1775 = vst [vmem:[%s209_s25 + $0x8] sm:$0xff] %v1772_v23 }
 0x19e   : > { %2045 = shalt.err (!%p2042_p10)
}
 0x19f   : > { %s2095_s10 = smov 128   ;;  %s2096_s12 = smov 8  }
 0x1a0   : > { %1901 = dma.vmem_to_hbm [thread:$0]  (%p2186_p5), %s1790_s26, 256, %s1792_s28, %s1777_s0, %s2095_s10, %s2095_s10, %s2096_s12  }
 0x1a1 PF: > { %p1918_p11 = scmp.ge.s32.totalorder %s2088_s17, 2  ;;  %s1806_s18 = sand.u32 1, %s2076_s14  }
 0x1a2   : > { %s1807_s19 = scalar_lea.sflag [#allocation5], %s1806_s18 }
 0x1a3   : > { %p1912_p12 = pnand %p1918_p11, %p2155_p6 }
 0x1a5   : > { %p1913_p13 = pneg %p1912_p12 }
 0x1a7   : > { %2071 = dma.done.wait (%p1913_p13), %s1807_s19, 256  }
 0x1a8   : > { %2073 = vsyncadd (%p1913_p13), %s1807_s19, 4294967040  ;;  %p18_p0 = scmp.ge.s32.totalorder %s2172_s27, 6   ;;  %s3454_s14 = smov %s2080_s15 }
 0x1a9   : > { %s3455_s15 = smov %s2084_s16  ;;  %s3456_s16 = smov %s2182_s5 }
 0x1aa   : > { %s3457_s17 = smov %s2172_s27  ;;  %20 = sbr.rel (!%p18_p0) target bundleno = 8 (0x8), region = 81 }
 0x1af   :  { %1813 = vsyncpa [#allocation4], 1 }
 0x1b0   :  { %1815 = vsyncpa [#allocation4 + $0x1], 1 }
 0x1b1   :  { %1816 = vsyncpa [#allocation7], 1 }
 0x1b2   :  { %1817 = vsyncpa [#allocation5], 1 }
 0x1b3   :  { %1819 = vsyncpa [#allocation5 + $0x1], 1 }

</bundles_post_ra>
